<compile_context>
chip_gen: v7x
topology: tpu7x:2x2x1
jax: 0.10.0
libtpu: 0.0.40
codegen_flags: <defaults>
</compile_context>

<pallas_src>
import numpy as np
import jax
import jax.numpy as jnp
from jax.experimental import pallas as pl
from jax.experimental.pallas import tpu as pltpu

# ---- module hyper-parameters (small shapes consistent with the module) ----
B       = 2     # batch
W0_DIM  = 32    # bottleneck co-modulation vector dim (x / x_global)
W_DIM   = 32    # intermediate latent dim (ws)
OC_N    = 32    # output channels of the block
RES     = 4     # first-block resolution (the conv is built with resolution=4)
HW      = RES * RES
RGB_N   = 3     # rgb channels
KSIZE   = 3
KK      = KSIZE * KSIZE
NUM_WS  = 2     # num_conv + num_torgb

SQRT2       = float(np.sqrt(2.0))
LRELU_ALPHA = 0.2
CLAMP       = 256.0

# packed bias buffer layout (vreg-aligned lane offsets)
CHW        = OC_N * HW          # 512
SEG_FC_B   = 0                  # fc bias            [512]
SEG_CONV_B = CHW                # conv bias (rep)    [512]
SEG_NOISE  = 2 * CHW            # noise const (rep)  [512]
SEG_AFF_B  = 3 * CHW            # fused affine bias  [64]  (padded to 128)
SEG_RGB_B  = 3 * CHW + 128      # rgb bias (rep)     [48]  (padded to 128)
PK_LEN     = 3 * CHW + 256      # 1792


def _lrelu_agc(y):
    # lrelu_agc(alpha=0.2, gain=sqrt(2), clamp=256)
    y = jnp.where(y >= 0.0, y, LRELU_ALPHA * y) * SQRT2
    return jnp.clip(y, -CLAMP, CLAMP)


# ------------------------- fused Pallas kernel -------------------------

def _synthesis_first_kernel(x_ref, x0_ref, ws_ref,
                            fc_wT_ref,
                            aw_ws_ref, aw_w0_ref,
                            expand_ref, wsq_ref, conv_A_ref, rgb_A_ref,
                            pkb_ref, noise_gain_ref,
                            x_out_ref, img_out_ref):
    f32 = jnp.float32
    bf16 = jnp.bfloat16

    w0 = x_ref[...]                              # [B, W0_DIM]   (x_global), f32
    w0b = w0.astype(bf16)
    wsb = ws_ref[...].astype(bf16)               # [B, NUM_WS*W_DIM] flattened ws

    # packed small vectors (static, vreg-aligned lane slices; one DMA)
    fc_b       = pkb_ref[:, SEG_FC_B:SEG_FC_B + CHW]          # [1, 512]
    conv_b_rep = pkb_ref[:, SEG_CONV_B:SEG_CONV_B + CHW]      # [1, 512]
    noise_base = pkb_ref[:, SEG_NOISE:SEG_NOISE + CHW]        # [1, 512]
    ab_both    = pkb_ref[:, SEG_AFF_B:SEG_AFF_B + 2 * OC_N]   # [1, 64]
    rgb_b_rep  = pkb_ref[:, SEG_RGB_B:SEG_RGB_B + RGB_N * HW] # [1, 48]

    # --- (1) fc + bias + lrelu_agc + residual x0 (NCHW-flat, lane-dense 512) ---
    h = jnp.dot(w0b, fc_wT_ref[...], preferred_element_type=f32)       # [B, OC*HW]
    h = _lrelu_agc(h + fc_b) + x0_ref[...]

    # --- (2) fused style affines for conv (s1) and torgb (s2): one [B, 2*OC]
    #         vector from two bf16 dots (concat of [ws_i, w0] folded into the
    #         zero-padded ws weight + the w0 weight). ---
    s_both = (jnp.dot(wsb, aw_ws_ref[...], preferred_element_type=f32)
              + jnp.dot(w0b, aw_w0_ref[...], preferred_element_type=f32)
              + ab_both)                                               # [B, 2*OC]
    s1 = s_both[:, :OC_N]                                              # conv style
    s2 = s_both[:, OC_N:]                                              # torgb style

    # demodulation, small f32 path: d[oc] = rsqrt(sum_ic s1[ic]^2 * wsq[ic,oc] + eps)
    d = jax.lax.rsqrt(
        jnp.dot(s1 * s1, wsq_ref[...], preferred_element_type=f32) + 1e-8)  # [B, OC]

    # pixel expansion of per-channel vectors over the 16 pixels (NCHW-flat),
    # via the shared bf16 0/1 expand matrix.
    expand = expand_ref[...]                                           # [OC, OC*HW] bf16
    s1_rep = jnp.dot(s1.astype(bf16), expand, preferred_element_type=f32)
    s2_rep = jnp.dot(s2.astype(bf16), expand, preferred_element_type=f32)
    d_rep  = jnp.dot(d.astype(bf16),  expand, preferred_element_type=f32)

    # --- (3) modulated 3x3 SAME conv over the fixed 4x4 grid as ONE dense matmul
    #         (spatial connectivity + zero padding baked into conv_A), then
    #         demod, noise, bias, lrelu_agc — all in NCHW-flat layout. ---
    hm = (h * s1_rep).astype(bf16)
    y = jnp.dot(hm, conv_A_ref[...], preferred_element_type=f32) * d_rep
    y = y + noise_base * noise_gain_ref[0, 0]
    y = _lrelu_agc(y + conv_b_rep)
    x_out_ref[...] = y                                                 # [B, OC*HW]

    # --- (4) ToRGB: 1x1 modulated conv (demodulate=False) + bias, NCHW-flat ---
    ym = (y * s2_rep).astype(bf16)
    img_out_ref[...] = (jnp.dot(ym, rgb_A_ref[...], preferred_element_type=f32)
                        + rgb_b_rep)                                   # [B, RGB*HW]


# ------------------------- pallas_call wrapper -------------------------

def _full_spec(shape):
    nd = len(shape)
    return pl.BlockSpec(shape, lambda *_: (0,) * nd)


def _fused_forward_call(x, x0f, wsf, pp, noise_gain):
    batch = x.shape[0]
    ins = (x, x0f, wsf,
           pp["fc_wT"],
           pp["aw_ws"], pp["aw_w0"],
           pp["expand"], pp["wsq"], pp["conv_A"], pp["rgb_A"],
           pp["packed_bias"], noise_gain)
    in_specs = [_full_spec(a.shape) for a in ins[:-1]]
    # noise gain is a (1,1) scalar -> SMEM (no (8,128)-padded VMEM tile / DMA).
    in_specs.append(pl.BlockSpec(memory_space=pltpu.MemorySpace.SMEM))
    # Note (v7x): we deliberately keep B=2 on a single TensorCore — splitting the
    # batch would duplicate the weight DMA (the dominant cost) to both cores.
    return pl.pallas_call(
        _synthesis_first_kernel,
        out_shape=(jax.ShapeDtypeStruct((batch, OC_N * HW), jnp.float32),
                   jax.ShapeDtypeStruct((batch, RGB_N * HW), jnp.float32)),
        grid=(1,),
        in_specs=in_specs,
        out_specs=(_full_spec((batch, OC_N * HW)),
                   _full_spec((batch, RGB_N * HW))),
        compiler_params=pltpu.CompilerParams(dimension_semantics=("arbitrary",)),
        cost_estimate=pl.CostEstimate(flops=2_600_000,
                                      transcendentals=64,
                                      bytes_accessed=660_000),
    )(*ins)


# ------------------------- one-time static weight preprocessing -------------------------

def prepare_params(params):
    """Hoist every style-independent transform out of the per-forward path."""
    cw = np.asarray(params["conv_w"], np.float32)        # [OC, IC, 3, 3]
    rw = np.asarray(params["rgb_w"], np.float32)         # [RGB, OC, 1, 1]
    aff_gain = 1.0 / np.sqrt(W0_DIM + W_DIM)
    rgb_gain = 1.0 / np.sqrt(OC_N)                       # torgb style weight_gain

    # fc: pre-scaled + transposed; output row order already NCHW-flat (oc, h, w).
    fc_wT = (np.asarray(params["fc_w"], np.float32) * (1.0 / np.sqrt(W0_DIM))).T
    fc_b = np.asarray(params["fc_b"], np.float32)

    # conv / torgb affines over cat([ws_i, w0]), fused side by side so the kernel
    # does ONE style dot pair. ws part is zero-padded over the flattened ws input
    # (ws0 feeds the conv style, ws1 feeds the torgb style).
    a1 = np.asarray(params["conv_aff_w"], np.float32) * aff_gain             # [OC, W+W0]
    a2 = np.asarray(params["rgb_aff_w"], np.float32) * aff_gain * rgb_gain   # [OC, W+W0]
    aw_ws = np.zeros((NUM_WS * W_DIM, 2 * OC_N), np.float32)
    aw_ws[:W_DIM, :OC_N] = a1[:, :W_DIM].T
    aw_ws[W_DIM:, OC_N:] = a2[:, :W_DIM].T
    aw_w0 = np.concatenate([a1[:, W_DIM:].T, a2[:, W_DIM:].T], axis=1)       # [W0, 2*OC]
    ab_both = np.concatenate(
        [np.asarray(params["conv_aff_b"], np.float32),
         np.asarray(params["rgb_aff_b"], np.float32) * rgb_gain])            # [2*OC]

    # expansion matrix: [B, OC] @ expand -> [B, OC*HW] with each channel value
    # repeated over its 16 pixels in NCHW-flat order. 0/1 values -> exact in bf16.
    expand = np.kron(np.eye(OC_N, dtype=np.float32),
                     np.ones((1, HW), np.float32))                           # [OC, OC*HW]

    # demod weight-square term, kept small [IC, OC] and in f32 (review: keep the
    # rsqrt/eps path in f32; built from the un-rounded conv weights).
    wsq = (cw * cw).sum(axis=(2, 3)).T                                       # [IC, OC]

    # 3x3 SAME conv over the fixed 4x4 grid as a dense [IC*HW, OC*HW] matrix
    # (exact reformulation; zero padding baked in).
    A = np.zeros((OC_N, RES, RES, OC_N, RES, RES), np.float32)               # [ic,r',s',oc,r,s]
    for ky in range(KSIZE):
        for kx in range(KSIZE):
            dy, dx = ky - 1, kx - 1
            for r in range(RES):
                rr = r + dy
                if not (0 <= rr < RES):
                    continue
                for s in range(RES):
                    ss = s + dx
                    if not (0 <= ss < RES):
                        continue
                    A[:, rr, ss, :, r, s] = cw[:, :, ky, kx].T               # [IC, OC]
    conv_A = A.reshape(OC_N * HW, OC_N * HW)

    conv_b_rep = np.repeat(np.asarray(params["conv_b"], np.float32), HW)     # [OC*HW]
    # per-pixel noise tiled over channels in NCHW-flat order
    noise_base = np.tile(np.asarray(params["noise_const"],
                                    np.float32).reshape(-1), OC_N)           # [OC*HW]

    # torgb: block-diagonal 1x1 conv matrix, NCHW-flat in and out
    rgb_A = np.kron(rw[:, :, 0, 0].T, np.eye(HW, dtype=np.float32))          # [OC*HW, RGB*HW]
    rgb_b_rep = np.repeat(np.asarray(params["rgb_b"], np.float32), HW)       # [RGB*HW]

    # pack the six small vectors into one lane-dense buffer (one DMA descriptor)
    packed = np.zeros((1, PK_LEN), np.float32)
    packed[0, SEG_FC_B:SEG_FC_B + CHW] = fc_b
    packed[0, SEG_CONV_B:SEG_CONV_B + CHW] = conv_b_rep
    packed[0, SEG_NOISE:SEG_NOISE + CHW] = noise_base
    packed[0, SEG_AFF_B:SEG_AFF_B + 2 * OC_N] = ab_both
    packed[0, SEG_RGB_B:SEG_RGB_B + RGB_N * HW] = rgb_b_rep

    j = jnp.asarray
    bf = jnp.bfloat16
    return {
        "fc_wT": j(fc_wT, dtype=bf),
        "aw_ws": j(aw_ws, dtype=bf), "aw_w0": j(aw_w0, dtype=bf),
        "expand": j(expand, dtype=bf),
        "wsq": j(wsq),                       # f32: demod path stays f32
        "conv_A": j(conv_A, dtype=bf),
        "rgb_A": j(rgb_A, dtype=bf),
        "packed_bias": j(packed),
        "noise_strength": jnp.asarray(params["noise_strength"],
                                      jnp.float32).reshape(1, 1),
    }


# ------------------------- forward (module semantics) -------------------------

def synthesis_block_first_forward(params, x, x0, ws, noise_mode="const",
                                  prepared=None):
    """Forward pass of synthesis_block_first. Returns (x, img), both NCHW."""
    x = x.astype(jnp.float32)
    x0 = x0.astype(jnp.float32)
    batch = x.shape[0]
    pp = prepared if prepared is not None else prepare_params(params)

    # pure-metadata reshapes only — no per-call XLA glue ops
    x0f = x0.reshape(batch, OC_N * HW)                  # NCHW-flat
    wsf = ws.astype(jnp.float32).reshape(batch, NUM_WS * W_DIM)

    if noise_mode == "none":
        noise_gain = jnp.zeros((1, 1), jnp.float32)
    else:
        # TODO(synk): noise_mode='random' draws from torch's RNG stream; we use
        # the deterministic 'const' path (noise_strength inits to 0, so
        # identical at init).
        noise_gain = pp["noise_strength"]

    x_flat, img_flat = _fused_forward_call(x, x0f, wsf, pp, noise_gain)

    # NCHW-flat outputs -> NCHW, free reshapes
    x_out = x_flat.reshape(batch, OC_N, RES, RES)
    img = img_flat.reshape(batch, RGB_N, RES, RES)
    return x_out, img


# ------------------------- deterministic parameter init -------------------------

def init_params(key):
    ks = jax.random.split(key, 6)
    return {
        "fc_w": jax.random.normal(ks[0], (OC_N * RES * RES, W0_DIM), jnp.float32),
        "fc_b": jnp.zeros((OC_N * RES * RES,), jnp.float32),
        "conv_aff_w": jax.random.normal(ks[1], (OC_N, W0_DIM + W_DIM), jnp.float32),
        "conv_aff_b": jnp.ones((OC_N,), jnp.float32),        # bias_init=1
        "conv_w": jax.random.normal(ks[2], (OC_N, OC_N, KSIZE, KSIZE), jnp.float32),
        "conv_b": jnp.zeros((OC_N,), jnp.float32),
        "noise_const": jax.random.normal(ks[3], (RES, RES), jnp.float32),
        "noise_strength": jnp.zeros((), jnp.float32),
        "rgb_aff_w": jax.random.normal(ks[4], (OC_N, W0_DIM + W_DIM), jnp.float32),
        "rgb_aff_b": jnp.ones((OC_N,), jnp.float32),         # bias_init=1
        "rgb_w": jax.random.normal(ks[5], (RGB_N, OC_N, 1, 1), jnp.float32),
        "rgb_b": jnp.zeros((RGB_N,), jnp.float32),
    }


# ------------------------- pure-JAX reference (for checking) -------------------------

def reference_forward(params, x, x0, ws):
    batch = x.shape[0]
    w0 = x
    w = params["fc_w"] * (1.0 / np.sqrt(W0_DIM))
    y = x @ w.T + params["fc_b"]
    y = jnp.clip(jnp.where(y >= 0, y, LRELU_ALPHA * y) * SQRT2, -CLAMP, CLAMP)
    h = y.reshape(batch, OC_N, RES, RES) + x0

    aff_gain = 1.0 / np.sqrt(W0_DIM + W_DIM)
    wl1 = jnp.concatenate([ws[:, 0], w0], axis=1)
    s1 = wl1 @ (params["conv_aff_w"] * aff_gain).T + params["conv_aff_b"]
    wmod = params["conv_w"][None] * s1[:, None, :, None, None]
    d = jax.lax.rsqrt(jnp.sum(wmod ** 2, axis=(2, 3, 4)) + 1e-8)
    wmod = wmod * d[:, :, None, None, None]
    ys = [jax.lax.conv_general_dilated(h[b:b + 1], wmod[b], (1, 1), "SAME",
                                       dimension_numbers=("NCHW", "OIHW", "NCHW"))
          for b in range(batch)]
    y2 = jnp.concatenate(ys, axis=0)
    y2 = y2 + params["noise_const"][None, None] * params["noise_strength"]
    y2 = y2 + params["conv_b"][None, :, None, None]
    y2 = jnp.clip(jnp.where(y2 >= 0, y2, LRELU_ALPHA * y2) * SQRT2, -CLAMP, CLAMP)

    wl2 = jnp.concatenate([ws[:, 1], w0], axis=1)
    s2 = (wl2 @ (params["rgb_aff_w"] * aff_gain).T + params["rgb_aff_b"]) * (1.0 / np.sqrt(OC_N))
    wm2 = params["rgb_w"][None] * s2[:, None, :, None, None]
    imgs = [jax.lax.conv_general_dilated(y2[b:b + 1], wm2[b], (1, 1), "SAME",
                                         dimension_numbers=("NCHW", "OIHW", "NCHW"))
            for b in range(batch)]
    img = jnp.concatenate(imgs, axis=0) + params["rgb_b"][None, :, None, None]
    return y2, img


if __name__ == "__main__":
    key = jax.random.PRNGKey(0)
    kp, kx, kx0, kws = jax.random.split(key, 4)
    params = init_params(kp)
    prepared = prepare_params(params)   # one-time static weight preprocessing

    x = jax.random.normal(kx, (B, W0_DIM), jnp.float32)
    x0 = jax.random.normal(kx0, (B, OC_N, RES, RES), jnp.float32)
    ws = jax.random.normal(kws, (B, NUM_WS, W_DIM), jnp.float32)

    @jax.jit
    def fwd(prepared, x, x0, ws):
        return synthesis_block_first_forward(None, x, x0, ws,
                                             noise_mode="const",
                                             prepared=prepared)

    x_out, img = fwd(prepared, x, x0, ws)
    jax.block_until_ready((x_out, img))

    x_ref, img_ref = reference_forward(params, x, x0, ws)
    assert x_out.shape == (B, OC_N, RES, RES)
    assert img.shape == (B, RGB_N, RES, RES)
    # tolerance covers bf16-weight / bf16-pass MXU matmuls in the kernel and the
    # default-precision matmuls in the reference.
    np.testing.assert_allclose(np.asarray(x_out), np.asarray(x_ref), rtol=5e-2, atol=5e-2)
    np.testing.assert_allclose(np.asarray(img), np.asarray(img_ref), rtol=5e-2, atol=5e-2)
    print("KERNEL_OK")
</pallas_src>

<mosaic_0001>
module attributes {stable_mosaic.version = 11 : i64} {
  func.func @_synthesis_first_kernel(%arg0: i32, %arg1: memref<2x32xf32, #tpu.memory_space<vmem>>, %arg2: memref<2x512xf32, #tpu.memory_space<vmem>>, %arg3: memref<2x64xf32, #tpu.memory_space<vmem>>, %arg4: memref<32x512xbf16, #tpu.memory_space<vmem>>, %arg5: memref<64x64xbf16, #tpu.memory_space<vmem>>, %arg6: memref<32x64xbf16, #tpu.memory_space<vmem>>, %arg7: memref<32x512xbf16, #tpu.memory_space<vmem>>, %arg8: memref<32x32xf32, #tpu.memory_space<vmem>>, %arg9: memref<512x512xbf16, #tpu.memory_space<vmem>>, %arg10: memref<512x48xbf16, #tpu.memory_space<vmem>>, %arg11: memref<1x1792xf32, #tpu.memory_space<vmem>>, %arg12: memref<1x1xf32, #tpu.memory_space<smem>>, %arg13: memref<2x512xf32, #tpu.memory_space<vmem>>, %arg14: memref<2x48xf32, #tpu.memory_space<vmem>>) attributes {dimension_semantics = [#tpu.dimension_semantics<arbitrary>], iteration_bounds = array<i64: 1>, scalar_prefetch = 0 : i64, scratch_operands = 0 : i64, tpu.core_type = #tpu.core_type<tc>, window_params = [{pipeline_mode = #tpu.pipeline_mode<synchronous>, transform_indices = @transform_0, window_bounds = array<i64: 2, 32>}, {pipeline_mode = #tpu.pipeline_mode<synchronous>, transform_indices = @transform_1, window_bounds = array<i64: 2, 512>}, {pipeline_mode = #tpu.pipeline_mode<synchronous>, transform_indices = @transform_2, window_bounds = array<i64: 2, 64>}, {pipeline_mode = #tpu.pipeline_mode<synchronous>, transform_indices = @transform_3, window_bounds = array<i64: 32, 512>}, {pipeline_mode = #tpu.pipeline_mode<synchronous>, transform_indices = @transform_4, window_bounds = array<i64: 64, 64>}, {pipeline_mode = #tpu.pipeline_mode<synchronous>, transform_indices = @transform_5, window_bounds = array<i64: 32, 64>}, {pipeline_mode = #tpu.pipeline_mode<synchronous>, transform_indices = @transform_6, window_bounds = array<i64: 32, 512>}, {pipeline_mode = #tpu.pipeline_mode<synchronous>, transform_indices = @transform_7, window_bounds = array<i64: 32, 32>}, {pipeline_mode = #tpu.pipeline_mode<synchronous>, transform_indices = @transform_8, window_bounds = array<i64: 512, 512>}, {pipeline_mode = #tpu.pipeline_mode<synchronous>, transform_indices = @transform_9, window_bounds = array<i64: 512, 48>}, {pipeline_mode = #tpu.pipeline_mode<synchronous>, transform_indices = @transform_10, window_bounds = array<i64: 1, 1792>}, {transform_indices = @transform_11, window_bounds = array<i64: 1, 1>}, {pipeline_mode = #tpu.pipeline_mode<synchronous>, transform_indices = @transform_12, window_bounds = array<i64: 2, 512>}, {pipeline_mode = #tpu.pipeline_mode<synchronous>, transform_indices = @transform_13, window_bounds = array<i64: 2, 48>}]} {
    %c0 = arith.constant 0 : index
    %c0_0 = arith.constant 0 : index
    %0 = vector.load %arg1[%c0, %c0_0] : memref<2x32xf32, #tpu.memory_space<vmem>>, vector<2x32xf32>
    %1 = arith.truncf %0 : vector<2x32xf32> to vector<2x32xbf16>
    %c0_1 = arith.constant 0 : index
    %c0_2 = arith.constant 0 : index
    %2 = vector.load %arg3[%c0_1, %c0_2] : memref<2x64xf32, #tpu.memory_space<vmem>>, vector<2x64xf32>
    %3 = arith.truncf %2 : vector<2x64xf32> to vector<2x64xbf16>
    %c0_3 = arith.constant 0 : index
    %c0_4 = arith.constant 0 : index
    %4 = vector.load %arg11[%c0_3, %c0_4] : memref<1x1792xf32, #tpu.memory_space<vmem>>, vector<1x512xf32>
    %c0_5 = arith.constant 0 : index
    %c512 = arith.constant 512 : index
    %5 = vector.load %arg11[%c0_5, %c512] : memref<1x1792xf32, #tpu.memory_space<vmem>>, vector<1x512xf32>
    %c0_6 = arith.constant 0 : index
    %c1024 = arith.constant 1024 : index
    %6 = vector.load %arg11[%c0_6, %c1024] : memref<1x1792xf32, #tpu.memory_space<vmem>>, vector<1x512xf32>
    %c0_7 = arith.constant 0 : index
    %c1536 = arith.constant 1536 : index
    %7 = vector.load %arg11[%c0_7, %c1536] : memref<1x1792xf32, #tpu.memory_space<vmem>>, vector<1x64xf32>
    %c0_8 = arith.constant 0 : index
    %c1664 = arith.constant 1664 : index
    %8 = vector.load %arg11[%c0_8, %c1664] : memref<1x1792xf32, #tpu.memory_space<vmem>>, vector<1x48xf32>
    %c0_9 = arith.constant 0 : index
    %c0_10 = arith.constant 0 : index
    %9 = vector.load %arg4[%c0_9, %c0_10] : memref<32x512xbf16, #tpu.memory_space<vmem>>, vector<32x512xbf16>
    %cst = arith.constant dense<0.000000e+00> : vector<2x512xf32>
    %10 = tpu.matmul %1, %9, %cst {dimension_numbers = #tpu.dot_dimension_numbers<[1], [0], [0], [1], [0, 0, 1, 1], [], []>} : vector<2x32xbf16>, vector<32x512xbf16>, vector<2x512xf32> -> vector<2x512xf32>
    %11 = vector.broadcast %4 : vector<1x512xf32> to vector<2x512xf32>
    %12 = arith.addf %10, %11 : vector<2x512xf32>
    %cst_11 = arith.constant 0.000000e+00 : f32
    %13 = vector.broadcast %cst_11 : f32 to vector<2x512xf32>
    %14 = arith.cmpf oge, %12, %13 : vector<2x512xf32>
    %cst_12 = arith.constant 2.000000e-01 : f32
    %15 = vector.broadcast %cst_12 : f32 to vector<2x512xf32>
    %16 = arith.mulf %15, %12 : vector<2x512xf32>
    %17 = arith.select %14, %12, %16 : vector<2x512xi1>, vector<2x512xf32>
    %cst_13 = arith.constant 1.41421354 : f32
    %18 = vector.broadcast %cst_13 : f32 to vector<2x512xf32>
    %19 = arith.mulf %17, %18 : vector<2x512xf32>
    %cst_14 = arith.constant -2.560000e+02 : f32
    %cst_15 = arith.constant 2.560000e+02 : f32
    %20 = vector.broadcast %cst_14 : f32 to vector<2x512xf32>
    %21 = arith.maximumf %20, %19 : vector<2x512xf32>
    %22 = vector.broadcast %cst_15 : f32 to vector<2x512xf32>
    %23 = arith.minimumf %22, %21 : vector<2x512xf32>
    %c0_16 = arith.constant 0 : index
    %c0_17 = arith.constant 0 : index
    %24 = vector.load %arg2[%c0_16, %c0_17] : memref<2x512xf32, #tpu.memory_space<vmem>>, vector<2x512xf32>
    %25 = arith.addf %23, %24 : vector<2x512xf32>
    %c0_18 = arith.constant 0 : index
    %c0_19 = arith.constant 0 : index
    %26 = vector.load %arg5[%c0_18, %c0_19] : memref<64x64xbf16, #tpu.memory_space<vmem>>, vector<64x64xbf16>
    %cst_20 = arith.constant dense<0.000000e+00> : vector<2x64xf32>
    %27 = tpu.matmul %3, %26, %cst_20 {dimension_numbers = #tpu.dot_dimension_numbers<[1], [0], [0], [1], [0, 0, 1, 1], [], []>} : vector<2x64xbf16>, vector<64x64xbf16>, vector<2x64xf32> -> vector<2x64xf32>
    %c0_21 = arith.constant 0 : index
    %c0_22 = arith.constant 0 : index
    %28 = vector.load %arg6[%c0_21, %c0_22] : memref<32x64xbf16, #tpu.memory_space<vmem>>, vector<32x64xbf16>
    %cst_23 = arith.constant dense<0.000000e+00> : vector<2x64xf32>
    %29 = tpu.matmul %1, %28, %cst_23 {dimension_numbers = #tpu.dot_dimension_numbers<[1], [0], [0], [1], [0, 0, 1, 1], [], []>} : vector<2x32xbf16>, vector<32x64xbf16>, vector<2x64xf32> -> vector<2x64xf32>
    %30 = arith.addf %27, %29 : vector<2x64xf32>
    %31 = vector.broadcast %7 : vector<1x64xf32> to vector<2x64xf32>
    %32 = arith.addf %30, %31 : vector<2x64xf32>
    %33 = vector.extract_strided_slice %32 {offsets = [0, 0], sizes = [2, 32], strides = [1, 1]} : vector<2x64xf32> to vector<2x32xf32>
    %34 = vector.extract_strided_slice %32 {offsets = [0, 32], sizes = [2, 32], strides = [1, 1]} : vector<2x64xf32> to vector<2x32xf32>
    %35 = arith.mulf %33, %33 : vector<2x32xf32>
    %c0_24 = arith.constant 0 : index
    %c0_25 = arith.constant 0 : index
    %36 = vector.load %arg8[%c0_24, %c0_25] : memref<32x32xf32, #tpu.memory_space<vmem>>, vector<32x32xf32>
    %cst_26 = arith.constant dense<0.000000e+00> : vector<2x32xf32>
    %37 = tpu.matmul %35, %36, %cst_26 {dimension_numbers = #tpu.dot_dimension_numbers<[1], [0], [0], [1], [0, 0, 1, 1], [], []>} : vector<2x32xf32>, vector<32x32xf32>, vector<2x32xf32> -> vector<2x32xf32>
    %cst_27 = arith.constant 9.99999993E-9 : f32
    %38 = vector.broadcast %cst_27 : f32 to vector<2x32xf32>
    %39 = arith.addf %37, %38 : vector<2x32xf32>
    %40 = math.rsqrt %39 : vector<2x32xf32>
    %c0_28 = arith.constant 0 : index
    %c0_29 = arith.constant 0 : index
    %41 = vector.load %arg7[%c0_28, %c0_29] : memref<32x512xbf16, #tpu.memory_space<vmem>>, vector<32x512xbf16>
    %42 = arith.truncf %33 : vector<2x32xf32> to vector<2x32xbf16>
    %cst_30 = arith.constant dense<0.000000e+00> : vector<2x512xf32>
    %43 = tpu.matmul %42, %41, %cst_30 {dimension_numbers = #tpu.dot_dimension_numbers<[1], [0], [0], [1], [0, 0, 1, 1], [], []>} : vector<2x32xbf16>, vector<32x512xbf16>, vector<2x512xf32> -> vector<2x512xf32>
    %44 = arith.truncf %34 : vector<2x32xf32> to vector<2x32xbf16>
    %cst_31 = arith.constant dense<0.000000e+00> : vector<2x512xf32>
    %45 = tpu.matmul %44, %41, %cst_31 {dimension_numbers = #tpu.dot_dimension_numbers<[1], [0], [0], [1], [0, 0, 1, 1], [], []>} : vector<2x32xbf16>, vector<32x512xbf16>, vector<2x512xf32> -> vector<2x512xf32>
    %46 = arith.truncf %40 : vector<2x32xf32> to vector<2x32xbf16>
    %cst_32 = arith.constant dense<0.000000e+00> : vector<2x512xf32>
    %47 = tpu.matmul %46, %41, %cst_32 {dimension_numbers = #tpu.dot_dimension_numbers<[1], [0], [0], [1], [0, 0, 1, 1], [], []>} : vector<2x32xbf16>, vector<32x512xbf16>, vector<2x512xf32> -> vector<2x512xf32>
    %48 = arith.mulf %25, %43 : vector<2x512xf32>
    %49 = arith.truncf %48 : vector<2x512xf32> to vector<2x512xbf16>
    %c0_33 = arith.constant 0 : index
    %c0_34 = arith.constant 0 : index
    %50 = vector.load %arg9[%c0_33, %c0_34] : memref<512x512xbf16, #tpu.memory_space<vmem>>, vector<512x512xbf16>
    %cst_35 = arith.constant dense<0.000000e+00> : vector<2x512xf32>
    %51 = tpu.matmul %49, %50, %cst_35 {dimension_numbers = #tpu.dot_dimension_numbers<[1], [0], [0], [1], [0, 0, 1, 1], [], []>} : vector<2x512xbf16>, vector<512x512xbf16>, vector<2x512xf32> -> vector<2x512xf32>
    %52 = arith.mulf %51, %47 : vector<2x512xf32>
    %c0_36 = arith.constant 0 : index
    %c0_37 = arith.constant 0 : index
    %53 = memref.load %arg12[%c0_36, %c0_37] : memref<1x1xf32, #tpu.memory_space<smem>>
    %54 = vector.broadcast %53 : f32 to vector<1x512xf32>
    %55 = arith.mulf %6, %54 : vector<1x512xf32>
    %56 = vector.broadcast %55 : vector<1x512xf32> to vector<2x512xf32>
    %57 = arith.addf %52, %56 : vector<2x512xf32>
    %58 = vector.broadcast %5 : vector<1x512xf32> to vector<2x512xf32>
    %59 = arith.addf %57, %58 : vector<2x512xf32>
    %cst_38 = arith.constant 0.000000e+00 : f32
    %60 = vector.broadcast %cst_38 : f32 to vector<2x512xf32>
    %61 = arith.cmpf oge, %59, %60 : vector<2x512xf32>
    %cst_39 = arith.constant 2.000000e-01 : f32
    %62 = vector.broadcast %cst_39 : f32 to vector<2x512xf32>
    %63 = arith.mulf %62, %59 : vector<2x512xf32>
    %64 = arith.select %61, %59, %63 : vector<2x512xi1>, vector<2x512xf32>
    %cst_40 = arith.constant 1.41421354 : f32
    %65 = vector.broadcast %cst_40 : f32 to vector<2x512xf32>
    %66 = arith.mulf %64, %65 : vector<2x512xf32>
    %cst_41 = arith.constant -2.560000e+02 : f32
    %cst_42 = arith.constant 2.560000e+02 : f32
    %67 = vector.broadcast %cst_41 : f32 to vector<2x512xf32>
    %68 = arith.maximumf %67, %66 : vector<2x512xf32>
    %69 = vector.broadcast %cst_42 : f32 to vector<2x512xf32>
    %70 = arith.minimumf %69, %68 : vector<2x512xf32>
    %c0_43 = arith.constant 0 : index
    %c0_44 = arith.constant 0 : index
    %71 = vector.load %arg13[%c0_43, %c0_44] : memref<2x512xf32, #tpu.memory_space<vmem>>, vector<2x512xf32>
    tpu.vector_store %arg13[%c0_43, %c0_44], %70 {strides = array<i32>} : memref<2x512xf32, #tpu.memory_space<vmem>>, vector<2x512xf32>,
    %72 = arith.mulf %70, %45 : vector<2x512xf32>
    %73 = arith.truncf %72 : vector<2x512xf32> to vector<2x512xbf16>
    %c0_45 = arith.constant 0 : index
    %c0_46 = arith.constant 0 : index
    %74 = vector.load %arg10[%c0_45, %c0_46] : memref<512x48xbf16, #tpu.memory_space<vmem>>, vector<512x48xbf16>
    %cst_47 = arith.constant dense<0.000000e+00> : vector<2x48xf32>
    %75 = tpu.matmul %73, %74, %cst_47 {dimension_numbers = #tpu.dot_dimension_numbers<[1], [0], [0], [1], [0, 0, 1, 1], [], []>} : vector<2x512xbf16>, vector<512x48xbf16>, vector<2x48xf32> -> vector<2x48xf32>
    %76 = vector.broadcast %8 : vector<1x48xf32> to vector<2x48xf32>
    %77 = arith.addf %75, %76 : vector<2x48xf32>
    %c0_48 = arith.constant 0 : index
    %c0_49 = arith.constant 0 : index
    %78 = vector.load %arg14[%c0_48, %c0_49] : memref<2x48xf32, #tpu.memory_space<vmem>>, vector<2x48xf32>
    tpu.vector_store %arg14[%c0_48, %c0_49], %77 {strides = array<i32>} : memref<2x48xf32, #tpu.memory_space<vmem>>, vector<2x48xf32>,
    return
  }
  func.func @transform_0(%arg0: i32) -> (i32, i32) {
    %c0_i32 = arith.constant 0 : i32
    %c0_i32_0 = arith.constant 0 : i32
    %c0_i32_1 = arith.constant 0 : i32
    return %c0_i32, %c0_i32_0 : i32, i32
  }
  func.func @transform_1(%arg0: i32) -> (i32, i32) {
    %c0_i32 = arith.constant 0 : i32
    %c0_i32_0 = arith.constant 0 : i32
    %c0_i32_1 = arith.constant 0 : i32
    return %c0_i32, %c0_i32_0 : i32, i32
  }
  func.func @transform_2(%arg0: i32) -> (i32, i32) {
    %c0_i32 = arith.constant 0 : i32
    %c0_i32_0 = arith.constant 0 : i32
    %c0_i32_1 = arith.constant 0 : i32
    return %c0_i32, %c0_i32_0 : i32, i32
  }
  func.func @transform_3(%arg0: i32) -> (i32, i32) {
    %c0_i32 = arith.constant 0 : i32
    %c0_i32_0 = arith.constant 0 : i32
    %c0_i32_1 = arith.constant 0 : i32
    return %c0_i32, %c0_i32_0 : i32, i32
  }
  func.func @transform_4(%arg0: i32) -> (i32, i32) {
    %c0_i32 = arith.constant 0 : i32
    %c0_i32_0 = arith.constant 0 : i32
    %c0_i32_1 = arith.constant 0 : i32
    return %c0_i32, %c0_i32_0 : i32, i32
  }
  func.func @transform_5(%arg0: i32) -> (i32, i32) {
    %c0_i32 = arith.constant 0 : i32
    %c0_i32_0 = arith.constant 0 : i32
    %c0_i32_1 = arith.constant 0 : i32
    return %c0_i32, %c0_i32_0 : i32, i32
  }
  func.func @transform_6(%arg0: i32) -> (i32, i32) {
    %c0_i32 = arith.constant 0 : i32
    %c0_i32_0 = arith.constant 0 : i32
    %c0_i32_1 = arith.constant 0 : i32
    return %c0_i32, %c0_i32_0 : i32, i32
  }
  func.func @transform_7(%arg0: i32) -> (i32, i32) {
    %c0_i32 = arith.constant 0 : i32
    %c0_i32_0 = arith.constant 0 : i32
    %c0_i32_1 = arith.constant 0 : i32
    return %c0_i32, %c0_i32_0 : i32, i32
  }
  func.func @transform_8(%arg0: i32) -> (i32, i32) {
    %c0_i32 = arith.constant 0 : i32
    %c0_i32_0 = arith.constant 0 : i32
    %c0_i32_1 = arith.constant 0 : i32
    return %c0_i32, %c0_i32_0 : i32, i32
  }
  func.func @transform_9(%arg0: i32) -> (i32, i32) {
    %c0_i32 = arith.constant 0 : i32
    %c0_i32_0 = arith.constant 0 : i32
    %c0_i32_1 = arith.constant 0 : i32
    return %c0_i32, %c0_i32_0 : i32, i32
  }
  func.func @transform_10(%arg0: i32) -> (i32, i32) {
    %c0_i32 = arith.constant 0 : i32
    %c0_i32_0 = arith.constant 0 : i32
    %c0_i32_1 = arith.constant 0 : i32
    return %c0_i32, %c0_i32_0 : i32, i32
  }
  func.func @transform_11(%arg0: i32) -> (i32, i32) {
    %c0_i32 = arith.constant 0 : i32
    %c0_i32_0 = arith.constant 0 : i32
    %c0_i32_1 = arith.constant 0 : i32
    return %c0_i32, %c0_i32_0 : i32, i32
  }
  func.func @transform_12(%arg0: i32) -> (i32, i32) {
    %c0_i32 = arith.constant 0 : i32
    %c0_i32_0 = arith.constant 0 : i32
    %c0_i32_1 = arith.constant 0 : i32
    return %c0_i32, %c0_i32_0 : i32, i32
  }
  func.func @transform_13(%arg0: i32) -> (i32, i32) {
    %c0_i32 = arith.constant 0 : i32
    %c0_i32_0 = arith.constant 0 : i32
    %c0_i32_1 = arith.constant 0 : i32
    return %c0_i32, %c0_i32_0 : i32, i32
  }
}

</mosaic_0001>

<bundles_post_ra>
// kernel: fwd.1
= control target key start
LH: loop header
LB: loop body
LE: loop exit
PB: predicated region body
PF: predicated region fallthrough
CT: control target
= control target key end

     0   :  { %20 = vsyncpa [#allocation4], 0  ;;  %s2800_s25 = smov [#allocation3]   ;;  %s3229_s0 = inlined_call_operand.vmem [shape: f32[2,32], index: 0, kind: input, shape index: {}]   ;;  %s3230_s1 = inlined_call_operand.vmem [shape: f32[2,512], index: 1, kind: input, shape index: {}]   ;;  %s3231_s2 = inlined_call_operand.vmem [shape: f32[2,64], index: 2, kind: input, shape index: {}]   ;;  %s3232_s3 = inlined_call_operand.vmem [shape: bf16[32,512], index: 3, kind: input, shape index: {}]   ;;  %s3233_s4 = inlined_call_operand.vmem [shape: bf16[64,64], index: 4, kind: input, shape index: {}]   ;;  %s3234_s5 = inlined_call_operand.vmem [shape: bf16[32,64], index: 5, kind: input, shape index: {}]   ;;  %s3235_s6 = inlined_call_operand.vmem [shape: bf16[32,512], index: 6, kind: input, shape index: {}]   ;;  %s3236_s7 = inlined_call_operand.vmem [shape: f32[32,32], index: 7, kind: input, shape index: {}]   ;;  %s3237_s8 = inlined_call_operand.hbm [shape: bf16[512,512], index: 8, kind: input, shape index: {}]   ;;  %s3238_s9 = inlined_call_operand.vmem [shape: bf16[512,48], index: 9, kind: input, shape index: {}]   ;;  %s3239_s10 = inlined_call_operand.vmem [shape: f32[1,1792], index: 10, kind: input, shape index: {}]   ;;  %s3240_s11 = inlined_call_operand.<no memory space> [shape: f32[1,1], index: 11, kind: input, shape index: {}]   ;;  %s3241_s12 = inlined_call_operand.vmem [shape: f32[2,512], index: 12, kind: output, shape index: {0}]   ;;  %s3242_s13 = inlined_call_operand.vmem [shape: f32[2,48], index: 13, kind: output, shape index: {1}]  }
   0x1   :  { %s42_s26 = sshll.u32 %s2800_s25, 4  ;;  %s2776_s29 = scalar_lea.hbm %s3237_s8, 16384  ;;  %s43_s26 = int_to_ptr.vmem [resolvable:$true] %s42_s26 }
   0x2   :  { %p2777_p0 = scmp.ne.s32.totalorder %s3237_s8, %s2776_s29  ;;  %p2780_p1 = scmp.lt.u32.totalorder %s2776_s29, %s3237_s8 }
   0x4   :  { %p2782_p2 = pnand %p2780_p1, %p2777_p0 }
   0x6   :  { %2785 = shalt.err (!%p2782_p2)
}
   0x7   :  { %s2786_s17 = scalar_lea.vmem %s43_s26, 16384  ;;  %p2791_p4 = scmp.lt.s32.totalorder %s43_s26, %s43_s26 }
   0x8   :  { %p2787_p3 = scmp.ne.s32.totalorder %s43_s26, %s2786_s17  ;;  %p2792_p5 = scmp.lt.s32.totalorder %s2786_s17, %s2786_s17 }
   0xa   :  { %p2793_p6 = por %p2792_p5, %p2791_p4 }
   0xc   :  { %p2794_p7 = pnand %p2793_p6, %p2787_p3 }
   0xe   :  { %2797 = shalt.err (!%p2794_p7)
}
   0xf   :  { %s2801_s18 = smov 256   ;;  %s2802_s19 = smov 16  }
  0x10   :  { %48 = dma.hbm_to_vmem [thread:$0]  %s3237_s8, 16384, %s43_s26, [#allocation4], %s2801_s18, %s2801_s18, %s2802_s19  }
  0x11   :  { %2798 = dma.done.wait [#allocation4], 16384  }
  0x12   :  { %2799 = vsyncadd [#allocation4], 4294950912  ;;  %v2803_v0 = vmov 0   ;;  %v2519_v1 = vld [vmem:[%s3232_s3 + $0xc] ss:$16 sps:$4 sm:$0xff]   ;;  %vm137_vm0 = vcmask 261120   ;;  %v77_v32 = vlaneseq }
  0x13   :  { %214 = vmatprep.mubr.bf16.mxu1 %v2803_v0  ;;  %173 = vmatprep.mubr.bf16.mxu0 %v2803_v0  ;;  %v2521_v2 = vld [vmem:[%s3232_s3 + $0x8] ss:$16 sps:$4 sm:$0xff]   ;;  %v2522_v3 = vld [vmem:[%s3232_s3 + $0x2c] ss:$16 sps:$4 sm:$0xff]   ;;  %v2524_v4 = vld [vmem:[%s3232_s3 + $0x4] ss:$16 sps:$4 sm:$0xff]  }
  0x14   :  { %182 = vmatprep.subr.bf16.mxu1 %v2519_v1  ;;  %v2526_v5 = vld [vmem:[%s3232_s3 + $0x28] ss:$16 sps:$4 sm:$0xff]   ;;  %v2527_v6 = vld [vmem:[%s3232_s3] ss:$16 sps:$4 sm:$0xff]   ;;  %141 = vmatprep.subr.bf16.mxu0 %v2524_v4  ;;  %v2528_v8 = vld [vmem:[%s3232_s3 + $0x24] ss:$16 sps:$4 sm:$0xff]  }
  0x15   :  { %183 = vmatpush1.bf16.msra.mxu1 %v2521_v2  ;;  %v59_v7 = vld [vmem:[%s3229_s0] sm:$0x3]  ;;  %142 = vmatpush1.bf16.msra.mxu0 %v2527_v6  ;;  %v2804_v12 = vmov 0.0   ;;  %v2532_v14 = vld [vmem:[%s3233_s4 + $0x8] sm:$0xff]   ;;  %vm2805_vm1 = vmmov 0   ;;  %v2534_v16 = vld [vmem:[%s3233_s4 + $0x10] sm:$0xff]  }
  0x16   :  { %184 = vmatprep.subr.bf16.mxu1 %v2522_v3  ;;  %v60_v9 = vpack.c.bf16 %v59_v7, %v59_v7  ;;  %v2531_v10 = vld [vmem:[%s3232_s3 + $0x20] ss:$16 sps:$4 sm:$0xff]   ;;  %143 = vmatprep.subr.bf16.mxu0 %v2528_v8  ;;  %v2535_v15 = vld [vmem:[%s3234_s5 + $0x8] sm:$0xff]   ;;  %v2536_v17 = vld [vmem:[%s3233_s4 + $0x18] sm:$0xff]   ;;  %vm362_vm2 = vcmask 523264   ;;  %v2806_v22 = vmov 0.0|0.0  }
  0x17   :  { %v2530_v11 = vld [vmem:[%s3233_s4] sm:$0xff]   ;;  %v415_v21 = vld [vmem:[%s3236_s7 + $0x8] sm:$0xff]  ;;  %v416_v26 = vld [vmem:[%s3236_s7 + $0x10] sm:$0xff]  ;;  %v2991_v33 = vshrl.u32 %v77_v32, 7  ;;  %v2807_v39 = vmov 1983009808  }
  0x18   :  { %v2533_v13 = vld [vmem:[%s3234_s5] sm:$0xff]   ;;  %v2957_v24 = vld [vmem:[%s3235_s6 + $0x8] ss:$16 sps:$4 sm:$0xff]   ;;  %v2962_v25 = vld [vmem:[%s3235_s6 + $0xc] ss:$16 sps:$4 sm:$0xff]   ;;  %v251_v40 = vunpack.c.l.s4 %v2807_v39  ;;  %s2808_s17 = smov 96  }
  0x19   :  { %185 = vmatpush1.bf16.msra.mxu1 %v2526_v5  ;;  %144 = vmatpush1.bf16.msra.mxu0 %v2531_v10  ;;  %v61_v18 = vld [vmem:[%s3231_s2] sm:$0x3]  ;;  %v417_v27 = vld [vmem:[%s3236_s7 + $0x18] sm:$0xff]  ;;  %v2987_v31 = vld [vmem:[%s3235_s6 + $0x4] ss:$16 sps:$4 sm:$0xff]   ;;  %v2994_v34 = vsub.s32 0, %v2991_v33 }
  0x1a   :  { %2473 = vmatprep.subr.bf16.mxu1 %v2804_v12  ;;  %2465 = vmatprep.subr.bf16.mxu0 %v2804_v12  ;;  %v62_v19 = vpack.c.bf16 %v61_v18, %v61_v18  ;;  %v414_v20 = vld [vmem:[%s3236_s7] sm:$0xff]  ;;  %v2500_v28 = vpack.c.bf16 %v417_v27, %v416_v26  ;;  %v2975_v29 = vld [vmem:[%s3235_s6 + $0x2c] ss:$16 sps:$4 sm:$0xff]   ;;  %v2980_v30 = vld [vmem:[%s3235_s6 + $0x28] ss:$16 sps:$4 sm:$0xff]   ;;  %v252_v47 = vunpack.c.0.s8 %v251_v40  ;;  %v3068_v18 = vsub.s32 1, %v2991_v33 }
  0x1b   :  { %v2497_v23 = vpack.c.bf16 %v415_v21, %v414_v20  ;;  %v2999_v35 = vld [vmem:[%s3239_s10] sm:$0xf]  ;;  %v2227_v61 = vld [vmem:[%s3239_s10 + $0xc] ss:$0 sm:$0xff]  ;;  %v2548_v8 = vld [vmem:[%s3235_s6 + $0x24] ss:$16 sps:$4 sm:$0xff]  }
  0x1c   :  { %2214 = vmatmul.mubr.msk.bf16.vlgmr.msra.gmra.mrb[0].mxu1 %vm137_vm0, %v60_v9  ;;  %2213 = vmatmul.mubr.msk.bf16.vlgmr.msra.gmra.mrb[0].mxu0 %vm137_vm0, %v60_v9  ;;  %v80_v37 = vrot.slane %v2999_v35, %v2994_v34  ;;  %v3010_v51 = vsub.s32 %v252_v47, %v2991_v33  ;;  %v3015_v53 = vld [vmem:[%s3230_s1] sm:$0xff]  ;;  %v84_v21 = vrot.slane %v2999_v35, %v3068_v18  ;;  %vm2194_vm11 = vcmask 386048  }
  0x1d   :  { %2474 = vmatpush3.bf16.msra.mxu1 %v2530_v11  ;;  %2481 = vmatprep.mubr.msk.bf16.mxu1 %vm2805_vm1, %v2804_v12  ;;  %v2543_v5 = vld [vmem:[%s3235_s6] ss:$16 sps:$4 sm:$0xff]   ;;  %v2552_v11 = vld [vmem:[#allocation3 + $0x4] ss:$16 sps:$4 sm:$0xff]  }
  0x1e   :  { %2475 = vmatprep.subr.bf16.mxu1 %v2804_v12  ;;  %2466 = vmatpush3.bf16.msra.mxu0 %v2533_v13  ;;  %v3019_v56 = vrot.slane %v3015_v53, %v3010_v51  ;;  %v3056_v13 = vsub.s32 2, %v2991_v33 }
  0x1f   :  { %2469 = vmatprep.mubr.msk.bf16.mxu0 %vm2805_vm1, %v2804_v12  ;;  %2467 = vmatprep.subr.bf16.mxu0 %v2804_v12 }
  0x21   :  { %2476 = vmatpush3.bf16.msra.mxu1 %v2532_v14  ;;  %v3059_v14 = vsub.s32 3, %v2991_v33 }
  0x22   :  { %2477 = vmatprep.subr.bf16.mxu1 %v2804_v12  ;;  %2468 = vmatpush3.bf16.msra.mxu0 %v2535_v15  ;;  %v88_v15 = vrot.slane %v2999_v35, %v3056_v13 }
  0x23   :  { %2496 = vmatprep.subr.bf16.mxu0 %v2806_v22 }
  0x25   :  { %2478 = vmatpush3.bf16.msra.mxu1 %v2534_v16  ;;  %2470 = vmatmul.mubr.msk.bf16.vlgmr.msra.gmra.mrb[4].mxu0 %vm137_vm0, %v60_v9  ;;  %v2546_v9 = vld [vmem:[%s3235_s6 + $0x20] ss:$16 sps:$4 sm:$0xff]   ;;  %v92_v16 = vrot.slane %v2999_v35, %v3059_v14 }
  0x26   :  { %2479 = vmatprep.subr.bf16.mxu1 %v2804_v12  ;;  %2493 = vmatprep.mubr.msk.f32.mxu0 %vm2805_vm1, %v2804_v12  ;;  %v2555_v12 = vld [vmem:[#allocation3 + $0xc] ss:$16 sps:$4 sm:$0xff]  }
  0x27   :  { %2498 = vmatpush3.bf16.msra.mxu0 %v2497_v23  ;;  %v249_v23 = vcombine.high %v3015_v53, %v3015_v53 }
  0x28   :  { %2499 = vmatprep.subr.bf16.mxu0 %v2806_v22 }
  0x29   :  { %2480 = vmatpush3.bf16.msra.mxu1 %v2536_v17  ;;  %v263_v27 = vrot.slane %v249_v23, %v3010_v51  ;;  %v2586_v23 = vld [vmem:[#allocation3 + $0xc0] ss:$16 sps:$4 sm:$0xff]  }
  0x2a   :  { %585 = vmatprep.subr.bf16.mxu1 %v2962_v25 }
  0x2b   :  { %2501 = vmatpush3.bf16.msra.mxu0 %v2500_v28  ;;  %v265_v32 = vcombine.high %v263_v27, %v263_v27 }
  0x2c   :  { %2482 = vmatmul.mubr.msk.bf16.vlgmr.msra.gmra.mrb[4].mxu1 %vm362_vm2, %v62_v19  ;;  %544 = vmatprep.subr.bf16.mxu0 %v2987_v31 }
  0x2d   :  { %617 = vmatprep.mubr.bf16.mxu1 %v2803_v0  ;;  %586 = vmatpush1.bf16.msra.mxu1 %v2957_v24 }
  0x2e   :  { %587 = vmatprep.subr.bf16.mxu1 %v2975_v29 }
  0x31   :  { %588 = vmatpush1.bf16.msra.mxu1 %v2980_v30 }
  0x32   :  { %673 = vmatprep.subr.bf16.mxu1 %v2962_v25 }
  0xef   :  { %v3001_v36 = vpop.f32.mrb[0].mxu1  ;;  %v175_v43 = vpop.f32.mrb[0].mxu0 }
  0xf0   :  { %v3005_v38 = vpop.f32.mrb[1].mxu1  ;;  %v176_v44 = vadd.f32 %v175_v43, %v80_v37  ;;  %v3007_v45 = vpop.f32.mrb[1].mxu0  ;;  %v217_v17 = vadd.f32 %v3001_v36, %v88_v15  ;;  %v2574_v15 = vld [vmem:[#allocation3 + $0x80] ss:$16 sps:$4 sm:$0xff]  }
  0xf1   :  { %v220_v41 = vpop.f32.mrb[2].mxu1  ;;  %v179_v46 = vpop.f32.mrb[2].mxu0 }
  0xf2   :  { %v221_v42 = vpop.f32.mrb[3].mxu1  ;;  %vm223_vm3 = vcmp.ge.f32.partialorder %v176_v44, 0.0  ;;  %v227_v48 = vmul.f32 0.2, %v176_v44  ;;  %v180_v49 = vpop.f32.mrb[3].mxu0  ;;  %vm225_vm4 = vcmp.ge.f32.partialorder %v217_v17, 0.0 }
  0xf3   :  { %v229_v19 = vmul.f32 0.2, %v217_v17 }
  0xf4   :  { %v231_v50 = vsel %vm223_vm3, %v176_v44, %v227_v48  ;;  %v264_v48 = vcombine.high %v3019_v56, %v3019_v56 }
  0xf5   :  { %v235_v52 = vmul.f32 1.4142135, %v231_v50  ;;  %v233_v22 = vsel %vm225_vm4, %v217_v17, %v229_v19  ;;  %v2582_v17 = vld [vmem:[#allocation3 + $0xa4] ss:$16 sps:$4 sm:$0xff]   ;;  %v2580_v19 = vld [vmem:[#allocation3 + $0xa0] ss:$16 sps:$4 sm:$0xff]  }
  0xf6   :  { %v237_v26 = vmul.f32 1.4142135, %v233_v22  ;;  %v2591_v22 = vld [vmem:[#allocation3 + $0xcc] ss:$16 sps:$4 sm:$0xff]  }
  0xf7   :  { %v2215_v55 = vclamps-f32 %v235_v52, 256.0 }
  0xf8   :  { %v332_v54 = vpop.f32.mrb[4].mxu0 }
  0xf9   :  { %v2471_v57 = vpop.f32.mrb[5].mxu0  ;;  %v3022_v59 = vadd.f32 %v2215_v55, %v3019_v56  ;;  %v2556_v56 = vld [vmem:[#allocation3 + $0x20] ss:$16 sps:$4 sm:$0xff]  }
  0xfa   :  { %v335_v58 = vpop.f32.mrb[6].mxu0 }
  0xfb   :  { %v2472_v60 = vpop.f32.mrb[7].mxu0 }
  0xfc   :  { %v2550_v60 = vld [vmem:[#allocation3] ss:$16 sps:$4 sm:$0xff]  }
  0xff   :  { %v400_v62 = vpop.f32.mrb[4].mxu1 }
 0x100   :  { %v401_v63 = vadd.f32 %v400_v62, %v332_v54  ;;  %v2483_v1 = vpop.f32.mrb[5].mxu1 }
 0x101   :  { %v403_v2 = vpop.f32.mrb[6].mxu1  ;;  %v2561_v1 = vld [vmem:[#allocation3 + $0x2c] ss:$16 sps:$4 sm:$0xff]  }
 0x102   :  { %v412_v3 = vadd.f32 %v2227_v61, %v401_v63  ;;  %v2484_v4 = vpop.f32.mrb[7].mxu1  ;;  %v2553_v61 = vld [vmem:[#allocation3 + $0x8] ss:$16 sps:$4 sm:$0xff]   ;;  %v2558_v63 = vld [vmem:[#allocation3 + $0x24] ss:$16 sps:$4 sm:$0xff]  }
 0x103   :  { %v2567_v4 = vld [vmem:[#allocation3 + $0x4c] ss:$16 sps:$4 sm:$0xff]  }
 0x104   :  { %v413_v6 = vmul.f32 %v412_v3, %v412_v3  ;;  %v500_v7 = vpack.c.bf16 %v412_v3, %v412_v3  ;;  %v2564_v3 = vld [vmem:[#allocation3 + $0x44] ss:$16 sps:$4 sm:$0xff]  }
 0x106   :  { %2494 = vmatmul.mubr.msk.f32.vlgmr.msra.gmra.mrb[8].mxu0 %vm137_vm0, %v413_v6  ;;  %2238 = vmatmul.mubr.msk.bf16.vlgmr.msra.gmra.mrb[8].mxu1 %vm137_vm0, %v500_v7  ;;  %v2565_v6 = vld [vmem:[#allocation3 + $0x48] ss:$16 sps:$4 sm:$0xff]  }
 0x107   :  { %545 = vmatpush1.bf16.msra.mxu0 %v2543_v5  ;;  %627 = vrot.lane.b32.xlu0 %v500_v7, %s2808_s17 }
 0x108   :  { %546 = vmatprep.subr.bf16.mxu0 %v2548_v8  ;;  %576 = vmatprep.mubr.bf16.mxu0 %v2803_v0 }
 0x109   :  { %674 = vmatpush1.bf16.msra.mxu1 %v2957_v24  ;;  %705 = vmatprep.mubr.bf16.mxu1 %v2803_v0 }
 0x10a   :  { %675 = vmatprep.subr.bf16.mxu1 %v2975_v29 }
 0x10b   :  { %547 = vmatpush1.bf16.msra.mxu0 %v2546_v9 }
 0x10c   :  { %632 = vmatprep.subr.bf16.mxu0 %v2987_v31 }
 0x10d   :  { %676 = vmatpush1.bf16.msra.mxu1 %v2980_v30 }
 0x10e   :  { %2237 = vmatmul.mubr.msk.bf16.vlgmr.msra.gmra.mrb[12].mxu0 %vm137_vm0, %v500_v7  ;;  %759 = vmatprep.subr.bf16.mxu1 %v2962_v25  ;;  %v178_v25 = vadd.f32 %v3007_v45, %v84_v21  ;;  %v2570_v7 = vld [vmem:[#allocation3 + $0x64] ss:$16 sps:$4 sm:$0xff]  }
 0x10f   :  { %633 = vmatpush1.bf16.msra.mxu0 %v2543_v5  ;;  %664 = vmatprep.mubr.bf16.mxu0 %v2803_v0  ;;  %v2588_v21 = vld [vmem:[#allocation3 + $0xc4] ss:$16 sps:$4 sm:$0xff]  }
 0x110   :  { %634 = vmatprep.subr.bf16.mxu0 %v2548_v8  ;;  %vm224_vm6 = vcmp.ge.f32.partialorder %v178_v25, 0.0 }
 0x113   :  { %635 = vmatpush1.bf16.msra.mxu0 %v2546_v9 }
 0x114   :  { %718 = vmatprep.subr.bf16.mxu0 %v2987_v31 }
 0x179   :  { %v628_v10 = vpop.permute.xlu0 %627 }
 0x17a   :  { %2239 = vmatmul.mubr.msk.bf16.vlgmr.msra.gmra.mrb[16].mxu0 %vm137_vm0, %v628_v10  ;;  %2240 = vmatmul.mubr.msk.bf16.vlgmr.msra.gmra.mrb[12].mxu1 %vm137_vm0, %v628_v10  ;;  %v2571_v10 = vld [vmem:[#allocation3 + $0x68] ss:$16 sps:$4 sm:$0xff]  }
 0x17b   :  { %719 = vmatpush1.bf16.msra.mxu0 %v2543_v5  ;;  %760 = vmatpush1.bf16.msra.mxu1 %v2957_v24  ;;  %v2562_v5 = vld [vmem:[#allocation3 + $0x40] ss:$16 sps:$4 sm:$0xff]  }
 0x17c   :  { %720 = vmatprep.subr.bf16.mxu0 %v2548_v8  ;;  %761 = vmatprep.subr.bf16.mxu1 %v2975_v29  ;;  %v228_v29 = vmul.f32 0.2, %v178_v25  ;;  %v2573_v8 = vld [vmem:[#allocation3 + $0x6c] ss:$16 sps:$4 sm:$0xff]  }
 0x17d   :  { %750 = vmatprep.mubr.bf16.mxu0 %v2803_v0  ;;  %791 = vmatprep.mubr.bf16.mxu1 %v2803_v0  ;;  %v219_v0 = vadd.f32 %v3005_v38, %v92_v16  ;;  %v2577_v16 = vld [vmem:[#allocation3 + $0x88] ss:$16 sps:$4 sm:$0xff]  }
 0x17e   :  { %v232_v33 = vsel %vm224_vm6, %v178_v25, %v228_v29  ;;  %v2594_v25 = vld [vmem:[#allocation3 + $0xe4] ss:$16 sps:$4 sm:$0xff]  }
 0x17f   :  { %721 = vmatpush1.bf16.msra.mxu0 %v2546_v9  ;;  %762 = vmatpush1.bf16.msra.mxu1 %v2980_v30  ;;  %v230_v20 = vmul.f32 0.2, %v219_v0  ;;  %vm226_vm5 = vcmp.ge.f32.partialorder %v219_v0, 0.0  ;;  %v2217_v30 = vclamps-f32 %v237_v26, 256.0  ;;  %v236_v39 = vmul.f32 1.4142135, %v232_v33 }
 0x180   :  { %1576 = vmatprep.subr.bf16.mxu0 %v2552_v11  ;;  %1658 = vmatprep.subr.bf16.mxu1 %v2555_v12  ;;  %v2568_v9 = vld [vmem:[#allocation3 + $0x60] ss:$16 sps:$4 sm:$0xff]   ;;  %v2576_v11 = vld [vmem:[#allocation3 + $0x84] ss:$16 sps:$4 sm:$0xff]   ;;  %v2579_v12 = vld [vmem:[#allocation3 + $0x8c] ss:$16 sps:$4 sm:$0xff]  }
 0x181   :  { %v234_v24 = vsel %vm226_vm5, %v219_v0, %v230_v20  ;;  %v272_v36 = vadd.f32 %v2217_v30, %v263_v27  ;;  %v2216_v47 = vclamps-f32 %v236_v39, 256.0  ;;  %v2585_v0 = vld [vmem:[#allocation3 + $0xac] ss:$16 sps:$4 sm:$0xff]   ;;  %v2583_v20 = vld [vmem:[#allocation3 + $0xa8] ss:$16 sps:$4 sm:$0xff]  }
 0x182   :  { %v238_v28 = vmul.f32 1.4142135, %v234_v24  ;;  %v2589_v24 = vld [vmem:[#allocation3 + $0xc8] ss:$16 sps:$4 sm:$0xff]   ;;  %v2597_v26 = vld [vmem:[#allocation3 + $0xec] ss:$16 sps:$4 sm:$0xff]  }
 0x183   :  { %v271_v50 = vadd.f32 %v2216_v47, %v264_v48  ;;  %v2592_v27 = vld [vmem:[#allocation3 + $0xe0] ss:$16 sps:$4 sm:$0xff]   ;;  %v2600_v29 = vld [vmem:[#allocation3 + $0x104] ss:$16 sps:$4 sm:$0xff]   ;;  %v2603_v30 = vld [vmem:[#allocation3 + $0x10c] ss:$16 sps:$4 sm:$0xff]  }
 0x184   :  { %v2218_v31 = vclamps-f32 %v238_v28, 256.0  ;;  %v2595_v28 = vld [vmem:[#allocation3 + $0xe8] ss:$16 sps:$4 sm:$0xff]   ;;  %v2606_v33 = vld [vmem:[#allocation3 + $0x124] ss:$16 sps:$4 sm:$0xff]  }
 0x185   :  { %v2615_v39 = vld [vmem:[#allocation3 + $0x14c] ss:$16 sps:$4 sm:$0xff]   ;;  %v2619_v47 = vld [vmem:[#allocation3 + $0x168] ss:$16 sps:$4 sm:$0xff]   ;;  %v2624_v48 = vld [vmem:[#allocation3 + $0x184] ss:$16 sps:$4 sm:$0xff]  }
 0x186   :  { %v273_v38 = vadd.f32 %v2218_v31, %v265_v32  ;;  %v2598_v31 = vld [vmem:[#allocation3 + $0x100] ss:$16 sps:$4 sm:$0xff]   ;;  %v2601_v32 = vld [vmem:[#allocation3 + $0x108] ss:$16 sps:$4 sm:$0xff]  }
 0x1d9   :  { %v487_v35 = vpop.f32.mrb[8].mxu0  ;;  %v619_v37 = vpop.f32.mrb[8].mxu1 }
 0x1da   :  { %v488_v40 = vadd.f32 1e-08, %v487_v35  ;;  %v3076_v41 = vmul.f32 %v619_v37, %v272_v36  ;;  %v2495_v42 = vpop.f32.mrb[9].mxu0  ;;  %v621_v43 = vpop.f32.mrb[9].mxu1  ;;  %v2609_v36 = vld [vmem:[#allocation3 + $0x12c] ss:$16 sps:$4 sm:$0xff]  }
 0x1db   :  { %v3078_v44 = vmul.f32 %v621_v43, %v273_v38  ;;  %v623_v45 = vpop.f32.mrb[10].mxu1  ;;  %v2604_v35 = vld [vmem:[#allocation3 + $0x120] ss:$16 sps:$4 sm:$0xff]   ;;  %v2607_v37 = vld [vmem:[#allocation3 + $0x128] ss:$16 sps:$4 sm:$0xff]  }
 0x1dc   :  { %2774 = vrsqrt.f32 %v488_v40  ;;  %v624_v46 = vpop.f32.mrb[11].mxu1  ;;  %v2612_v38 = vld [vmem:[#allocation3 + $0x144] ss:$16 sps:$4 sm:$0xff]   ;;  %v2610_v40 = vld [vmem:[#allocation3 + $0x140] ss:$16 sps:$4 sm:$0xff]  }
 0x1dd   :  { %v2613_v42 = vld [vmem:[#allocation3 + $0x148] ss:$16 sps:$4 sm:$0xff]   ;;  %v2618_v43 = vld [vmem:[#allocation3 + $0x164] ss:$16 sps:$4 sm:$0xff]   ;;  %v2621_v45 = vld [vmem:[#allocation3 + $0x16c] ss:$16 sps:$4 sm:$0xff]  }
 0x1de   :  { %v2616_v46 = vld [vmem:[#allocation3 + $0x160] ss:$16 sps:$4 sm:$0xff]  }
 0x1e1   :  { %v578_v49 = vpop.f32.mrb[12].mxu0 }
 0x1e2   :  { %v3083_v52 = vmul.f32 %v578_v49, %v3022_v59  ;;  %v580_v53 = vpop.f32.mrb[13].mxu0  ;;  %v2559_v59 = vld [vmem:[#allocation3 + $0x28] ss:$16 sps:$4 sm:$0xff]   ;;  %v2627_v49 = vld [vmem:[#allocation3 + $0x18c] ss:$16 sps:$4 sm:$0xff]  }
 0x1e3   :  { %v801_v54 = vmul.f32 %v580_v53, %v271_v50  ;;  %v582_v55 = vpop.f32.mrb[14].mxu0  ;;  %v2622_v50 = vld [vmem:[#allocation3 + $0x180] ss:$16 sps:$4 sm:$0xff]   ;;  %v2625_v53 = vld [vmem:[#allocation3 + $0x188] ss:$16 sps:$4 sm:$0xff]  }
 0x1e4   :  { %v583_v57 = vpop.f32.mrb[15].mxu0  ;;  %v2633_v55 = vld [vmem:[#allocation3 + $0x1ac] ss:$16 sps:$4 sm:$0xff]  }
 0x1e5   :  { %v805_v2 = vpack.c.bf16 %v801_v54, %v801_v54  ;;  %v2630_v54 = vld [vmem:[#allocation3 + $0x1a4] ss:$16 sps:$4 sm:$0xff]   ;;  %v2628_v57 = vld [vmem:[#allocation3 + $0x1a0] ss:$16 sps:$4 sm:$0xff]  }
 0x1e6   :  { %v2775_v58 = vpop.eup %2774 }
 0x1e7   :  { %v714_v62 = vpack.c.bf16 %v2775_v58, %v2775_v58  ;;  %v2631_v58 = vld [vmem:[#allocation3 + $0x1a8] ss:$16 sps:$4 sm:$0xff]  }
 0x1e9   :  { %2241 = vmatmul.mubr.msk.bf16.vlgmr.msra.gmra.mrb[20].mxu0 %vm137_vm0, %v714_v62  ;;  %2242 = vmatmul.mubr.msk.bf16.vlgmr.msra.gmra.mrb[16].mxu1 %vm137_vm0, %v714_v62  ;;  %v2634_v62 = vld [vmem:[#allocation3 + $0x1c0] ss:$16 sps:$4 sm:$0xff]  }
 0x1ea   :  { %1577 = vmatpush1.bf16.msra.mxu0 %v2550_v60  ;;  %1659 = vmatpush1.bf16.msra.mxu1 %v2553_v61  ;;  %v2636_v60 = vld [vmem:[#allocation3 + $0x1c4] ss:$16 sps:$4 sm:$0xff]   ;;  %v2639_v61 = vld [vmem:[#allocation3 + $0x1cc] ss:$16 sps:$4 sm:$0xff]  }
 0x1eb   :  { %1608 = vmatprep.mubr.bf16.mxu0 %v805_v2  ;;  %1690 = vmatprep.mubr.bf16.mxu1 %v805_v2  ;;  %v2645_v2 = vld [vmem:[#allocation3 + $0x1ec] ss:$16 sps:$4 sm:$0xff]  }
 0x1ec   :  { %1578 = vmatprep.subr.bf16.mxu0 %v2558_v63  ;;  %1660 = vmatprep.subr.bf16.mxu1 %v2561_v1  ;;  %v2637_v63 = vld [vmem:[#allocation3 + $0x1c8] ss:$16 sps:$4 sm:$0xff]   ;;  %v2642_v1 = vld [vmem:[#allocation3 + $0x1e4] ss:$16 sps:$4 sm:$0xff]  }
 0x1ee   :  { %1579 = vmatpush1.bf16.msra.mxu0 %v2556_v56  ;;  %1661 = vmatpush1.bf16.msra.mxu1 %v2559_v59  ;;  %v2640_v56 = vld [vmem:[#allocation3 + $0x1e0] ss:$16 sps:$4 sm:$0xff]   ;;  %v2643_v59 = vld [vmem:[#allocation3 + $0x1e8] ss:$16 sps:$4 sm:$0xff]  }
 0x1ef   :  { %1580 = vmatprep.subr.bf16.mxu0 %v2564_v3  ;;  %1662 = vmatprep.subr.bf16.mxu1 %v2567_v4  ;;  %v2648_v3 = vld [vmem:[#allocation3 + $0x204] ss:$16 sps:$4 sm:$0xff]   ;;  %v2651_v4 = vld [vmem:[#allocation3 + $0x20c] ss:$16 sps:$4 sm:$0xff]  }
 0x1f2   :  { %1581 = vmatpush1.bf16.msra.mxu0 %v2562_v5  ;;  %1663 = vmatpush1.bf16.msra.mxu1 %v2565_v6  ;;  %v2646_v5 = vld [vmem:[#allocation3 + $0x200] ss:$16 sps:$4 sm:$0xff]   ;;  %v804_v6 = vpack.c.bf16 %v3083_v52, %v3083_v52  ;;  %v2663_v52 = vld [vmem:[#allocation3 + $0x24c] ss:$16 sps:$4 sm:$0xff]  }
 0x1f3   :  { %1582 = vmatprep.subr.bf16.mxu0 %v2570_v7  ;;  %1664 = vmatprep.subr.bf16.mxu1 %v2573_v8  ;;  %v2649_v7 = vld [vmem:[#allocation3 + $0x208] ss:$16 sps:$4 sm:$0xff]   ;;  %v807_v8 = vpack.c.bf16 %v3078_v44, %v3078_v44  ;;  %v2666_v44 = vld [vmem:[#allocation3 + $0x264] ss:$16 sps:$4 sm:$0xff]  }
 0x1f6   :  { %1583 = vmatpush1.bf16.msra.mxu0 %v2568_v9  ;;  %1665 = vmatpush1.bf16.msra.mxu1 %v2571_v10  ;;  %v2654_v9 = vld [vmem:[#allocation3 + $0x224] ss:$16 sps:$4 sm:$0xff]   ;;  %v2657_v10 = vld [vmem:[#allocation3 + $0x22c] ss:$16 sps:$4 sm:$0xff]  }
 0x1f7   :  { %1584 = vmatprep.subr.bf16.mxu0 %v2576_v11  ;;  %1666 = vmatprep.subr.bf16.mxu1 %v2579_v12  ;;  %v2652_v11 = vld [vmem:[#allocation3 + $0x220] ss:$16 sps:$4 sm:$0xff]   ;;  %v2655_v12 = vld [vmem:[#allocation3 + $0x228] ss:$16 sps:$4 sm:$0xff]  }
 0x1fa   :  { %1585 = vmatpush1.bf16.msra.mxu0 %v2574_v15  ;;  %1667 = vmatpush1.bf16.msra.mxu1 %v2577_v16  ;;  %v2660_v15 = vld [vmem:[#allocation3 + $0x244] ss:$16 sps:$4 sm:$0xff]   ;;  %v2658_v16 = vld [vmem:[#allocation3 + $0x240] ss:$16 sps:$4 sm:$0xff]  }
 0x1fb   :  { %1586 = vmatprep.subr.bf16.mxu0 %v2582_v17  ;;  %1668 = vmatprep.subr.bf16.mxu1 %v2585_v0  ;;  %v2661_v17 = vld [vmem:[#allocation3 + $0x248] ss:$16 sps:$4 sm:$0xff]   ;;  %v2669_v0 = vld [vmem:[#allocation3 + $0x26c] ss:$16 sps:$4 sm:$0xff]  }
 0x1fe   :  { %1587 = vmatpush1.bf16.msra.mxu0 %v2580_v19  ;;  %1669 = vmatpush1.bf16.msra.mxu1 %v2583_v20  ;;  %v2664_v19 = vld [vmem:[#allocation3 + $0x260] ss:$16 sps:$4 sm:$0xff]   ;;  %v2667_v20 = vld [vmem:[#allocation3 + $0x268] ss:$16 sps:$4 sm:$0xff]  }
 0x1ff   :  { %1588 = vmatprep.subr.bf16.mxu0 %v2588_v21  ;;  %1670 = vmatprep.subr.bf16.mxu1 %v2591_v22  ;;  %v2672_v21 = vld [vmem:[#allocation3 + $0x284] ss:$16 sps:$4 sm:$0xff]   ;;  %v2675_v22 = vld [vmem:[#allocation3 + $0x28c] ss:$16 sps:$4 sm:$0xff]  }
 0x202   :  { %1589 = vmatpush1.bf16.msra.mxu0 %v2586_v23  ;;  %1671 = vmatpush1.bf16.msra.mxu1 %v2589_v24  ;;  %v2670_v23 = vld [vmem:[#allocation3 + $0x280] ss:$16 sps:$4 sm:$0xff]   ;;  %v2673_v24 = vld [vmem:[#allocation3 + $0x288] ss:$16 sps:$4 sm:$0xff]  }
 0x203   :  { %1590 = vmatprep.subr.bf16.mxu0 %v2594_v25  ;;  %1672 = vmatprep.subr.bf16.mxu1 %v2597_v26  ;;  %v2678_v25 = vld [vmem:[#allocation3 + $0x2a4] ss:$16 sps:$4 sm:$0xff]   ;;  %v2681_v26 = vld [vmem:[#allocation3 + $0x2ac] ss:$16 sps:$4 sm:$0xff]  }
 0x206   :  { %1591 = vmatpush1.bf16.msra.mxu0 %v2592_v27  ;;  %1673 = vmatpush1.bf16.msra.mxu1 %v2595_v28  ;;  %v2676_v27 = vld [vmem:[#allocation3 + $0x2a0] ss:$16 sps:$4 sm:$0xff]   ;;  %v2679_v28 = vld [vmem:[#allocation3 + $0x2a8] ss:$16 sps:$4 sm:$0xff]  }
 0x207   :  { %1592 = vmatprep.subr.bf16.mxu0 %v2600_v29  ;;  %1674 = vmatprep.subr.bf16.mxu1 %v2603_v30  ;;  %v2684_v29 = vld [vmem:[#allocation3 + $0x2c4] ss:$16 sps:$4 sm:$0xff]   ;;  %v2687_v30 = vld [vmem:[#allocation3 + $0x2cc] ss:$16 sps:$4 sm:$0xff]  }
 0x20a   :  { %1593 = vmatpush1.bf16.msra.mxu0 %v2598_v31  ;;  %1675 = vmatpush1.bf16.msra.mxu1 %v2601_v32  ;;  %v2682_v31 = vld [vmem:[#allocation3 + $0x2c0] ss:$16 sps:$4 sm:$0xff]   ;;  %v2685_v32 = vld [vmem:[#allocation3 + $0x2c8] ss:$16 sps:$4 sm:$0xff]  }
 0x20b   :  { %1594 = vmatprep.subr.bf16.mxu0 %v2606_v33  ;;  %1676 = vmatprep.subr.bf16.mxu1 %v2609_v36  ;;  %v2690_v33 = vld [vmem:[#allocation3 + $0x2e4] ss:$16 sps:$4 sm:$0xff]   ;;  %v2693_v36 = vld [vmem:[#allocation3 + $0x2ec] ss:$16 sps:$4 sm:$0xff]  }
 0x20e   :  { %1595 = vmatpush1.bf16.msra.mxu0 %v2604_v35  ;;  %1677 = vmatpush1.bf16.msra.mxu1 %v2607_v37  ;;  %v2688_v35 = vld [vmem:[#allocation3 + $0x2e0] ss:$16 sps:$4 sm:$0xff]   ;;  %v2691_v37 = vld [vmem:[#allocation3 + $0x2e8] ss:$16 sps:$4 sm:$0xff]  }
 0x20f   :  { %1596 = vmatprep.subr.bf16.mxu0 %v2612_v38  ;;  %1678 = vmatprep.subr.bf16.mxu1 %v2615_v39  ;;  %v2696_v38 = vld [vmem:[#allocation3 + $0x304] ss:$16 sps:$4 sm:$0xff]   ;;  %v2699_v39 = vld [vmem:[#allocation3 + $0x30c] ss:$16 sps:$4 sm:$0xff]  }
 0x212   :  { %1597 = vmatpush1.bf16.msra.mxu0 %v2610_v40  ;;  %1679 = vmatpush1.bf16.msra.mxu1 %v2613_v42  ;;  %v2694_v40 = vld [vmem:[#allocation3 + $0x300] ss:$16 sps:$4 sm:$0xff]   ;;  %v2697_v42 = vld [vmem:[#allocation3 + $0x308] ss:$16 sps:$4 sm:$0xff]  }
 0x213   :  { %1598 = vmatprep.subr.bf16.mxu0 %v2618_v43  ;;  %1680 = vmatprep.subr.bf16.mxu1 %v2621_v45  ;;  %v2702_v43 = vld [vmem:[#allocation3 + $0x324] ss:$16 sps:$4 sm:$0xff]   ;;  %v2705_v45 = vld [vmem:[#allocation3 + $0x32c] ss:$16 sps:$4 sm:$0xff]  }
 0x216   :  { %1599 = vmatpush1.bf16.msra.mxu0 %v2616_v46  ;;  %1681 = vmatpush1.bf16.msra.mxu1 %v2619_v47  ;;  %v2700_v46 = vld [vmem:[#allocation3 + $0x320] ss:$16 sps:$4 sm:$0xff]   ;;  %v2703_v47 = vld [vmem:[#allocation3 + $0x328] ss:$16 sps:$4 sm:$0xff]  }
 0x217   :  { %1600 = vmatprep.subr.bf16.mxu0 %v2624_v48  ;;  %1682 = vmatprep.subr.bf16.mxu1 %v2627_v49  ;;  %v2708_v48 = vld [vmem:[#allocation3 + $0x344] ss:$16 sps:$4 sm:$0xff]   ;;  %v2711_v49 = vld [vmem:[#allocation3 + $0x34c] ss:$16 sps:$4 sm:$0xff]  }
 0x21a   :  { %1601 = vmatpush1.bf16.msra.mxu0 %v2622_v50  ;;  %1683 = vmatpush1.bf16.msra.mxu1 %v2625_v53 }
 0x21b   :  { %1602 = vmatprep.subr.bf16.mxu0 %v2630_v54  ;;  %1684 = vmatprep.subr.bf16.mxu1 %v2633_v55 }
 0x21e   :  { %1603 = vmatpush1.bf16.msra.mxu0 %v2628_v57  ;;  %1685 = vmatpush1.bf16.msra.mxu1 %v2631_v58  ;;  %v2706_v57 = vld [vmem:[#allocation3 + $0x340] ss:$16 sps:$4 sm:$0xff]  }
 0x21f   :  { %1604 = vmatprep.subr.bf16.mxu0 %v2636_v60  ;;  %1686 = vmatprep.subr.bf16.mxu1 %v2639_v61  ;;  %v2709_v61 = vld [vmem:[#allocation3 + $0x348] ss:$16 sps:$4 sm:$0xff]  }
 0x222   :  { %1605 = vmatpush1.bf16.msra.mxu0 %v2634_v62  ;;  %1687 = vmatpush1.bf16.msra.mxu1 %v2637_v63  ;;  %v2714_v62 = vld [vmem:[#allocation3 + $0x364] ss:$16 sps:$4 sm:$0xff]  }
 0x223   :  { %1606 = vmatprep.subr.bf16.mxu0 %v2642_v1  ;;  %1688 = vmatprep.subr.bf16.mxu1 %v2645_v2  ;;  %v2717_v2 = vld [vmem:[#allocation3 + $0x36c] ss:$16 sps:$4 sm:$0xff]  }
 0x226   :  { %1607 = vmatpush1.bf16.msra.mxu0 %v2640_v56  ;;  %1689 = vmatpush1.bf16.msra.mxu1 %v2643_v59  ;;  %v2712_v56 = vld [vmem:[#allocation3 + $0x360] ss:$16 sps:$4 sm:$0xff]   ;;  %v2715_v59 = vld [vmem:[#allocation3 + $0x368] ss:$16 sps:$4 sm:$0xff]  }
 0x227   :  { %1617 = vmatprep.subr.bf16.mxu0 %v2648_v3  ;;  %1699 = vmatprep.subr.bf16.mxu1 %v2651_v4  ;;  %v2720_v3 = vld [vmem:[#allocation3 + $0x384] ss:$16 sps:$4 sm:$0xff]   ;;  %v2723_v4 = vld [vmem:[#allocation3 + $0x38c] ss:$16 sps:$4 sm:$0xff]  }
 0x229   :  { %1609 = vmatmul.mubr.bf16.vlgmr.msra.gmra.mrb[24].mxu0 %v804_v6  ;;  %1691 = vmatmul.mubr.bf16.vlgmr.msra.gmra.mrb[20].mxu1 %v804_v6  ;;  %v2721_v6 = vld [vmem:[#allocation3 + $0x388] ss:$16 sps:$4 sm:$0xff]  }
 0x22a   :  { %1618 = vmatpush1.bf16.msra.mxu0 %v2646_v5  ;;  %1649 = vmatprep.mubr.bf16.mxu0 %v807_v8  ;;  %v2718_v5 = vld [vmem:[#allocation3 + $0x380] ss:$16 sps:$4 sm:$0xff]  }
 0x22b   :  { %1700 = vmatpush1.bf16.msra.mxu1 %v2649_v7  ;;  %1731 = vmatprep.mubr.bf16.mxu1 %v807_v8  ;;  %v2726_v7 = vld [vmem:[#allocation3 + $0x3a4] ss:$16 sps:$4 sm:$0xff]   ;;  %v2729_v8 = vld [vmem:[#allocation3 + $0x3ac] ss:$16 sps:$4 sm:$0xff]  }
 0x22c   :  { %1619 = vmatprep.subr.bf16.mxu0 %v2654_v9  ;;  %1701 = vmatprep.subr.bf16.mxu1 %v2657_v10  ;;  %v2724_v9 = vld [vmem:[#allocation3 + $0x3a0] ss:$16 sps:$4 sm:$0xff]   ;;  %v2727_v10 = vld [vmem:[#allocation3 + $0x3a8] ss:$16 sps:$4 sm:$0xff]  }
 0x22e   :  { %1620 = vmatpush1.bf16.msra.mxu0 %v2652_v11  ;;  %v2732_v11 = vld [vmem:[#allocation3 + $0x3c4] ss:$16 sps:$4 sm:$0xff]  }
 0x22f   :  { %1702 = vmatpush1.bf16.msra.mxu1 %v2655_v12  ;;  %1621 = vmatprep.subr.bf16.mxu0 %v2660_v15  ;;  %v2735_v12 = vld [vmem:[#allocation3 + $0x3cc] ss:$16 sps:$4 sm:$0xff]   ;;  %v2730_v15 = vld [vmem:[#allocation3 + $0x3c0] ss:$16 sps:$4 sm:$0xff]  }
 0x230   :  { %1703 = vmatprep.subr.bf16.mxu1 %v2663_v52  ;;  %v2733_v52 = vld [vmem:[#allocation3 + $0x3c8] ss:$16 sps:$4 sm:$0xff]  }
 0x232   :  { %1622 = vmatpush1.bf16.msra.mxu0 %v2658_v16  ;;  %v2738_v16 = vld [vmem:[#allocation3 + $0x3e4] ss:$16 sps:$4 sm:$0xff]  }
 0x233   :  { %1704 = vmatpush1.bf16.msra.mxu1 %v2661_v17  ;;  %1623 = vmatprep.subr.bf16.mxu0 %v2666_v44  ;;  %v2741_v17 = vld [vmem:[#allocation3 + $0x3ec] ss:$16 sps:$4 sm:$0xff]   ;;  %v2736_v44 = vld [vmem:[#allocation3 + $0x3e0] ss:$16 sps:$4 sm:$0xff]  }
 0x234   :  { %1705 = vmatprep.subr.bf16.mxu1 %v2669_v0  ;;  %v2739_v0 = vld [vmem:[#allocation3 + $0x3e8] ss:$16 sps:$4 sm:$0xff]  }
 0x236   :  { %1624 = vmatpush1.bf16.msra.mxu0 %v2664_v19  ;;  %v2742_v19 = vld [vmem:[%s3238_s9 + $0x40] sm:$0xff]  }
 0x237   :  { %1706 = vmatpush1.bf16.msra.mxu1 %v2667_v20  ;;  %1625 = vmatprep.subr.bf16.mxu0 %v2672_v21  ;;  %v2743_v20 = vld [vmem:[%s3238_s9 + $0xc0] sm:$0xff]  }
 0x238   :  { %1707 = vmatprep.subr.bf16.mxu1 %v2675_v22  ;;  %v2744_v21 = vld [vmem:[%s3238_s9] sm:$0xff]   ;;  %v806_v22 = vpack.c.bf16 %v3076_v41, %v3076_v41  ;;  %v2748_v41 = vld [vmem:[%s3238_s9 + $0x8] sm:$0xff]  }
 0x23a   :  { %1626 = vmatpush1.bf16.msra.mxu0 %v2670_v23  ;;  %v2745_v23 = vld [vmem:[%s3238_s9 + $0x80] sm:$0xff]  }
 0x23b   :  { %1708 = vmatpush1.bf16.msra.mxu1 %v2673_v24  ;;  %1627 = vmatprep.subr.bf16.mxu0 %v2678_v25  ;;  %v2746_v24 = vld [vmem:[%s3238_s9 + $0x48] sm:$0xff]  }
 0x23c   :  { %1709 = vmatprep.subr.bf16.mxu1 %v2681_v26  ;;  %v2747_v25 = vld [vmem:[%s3238_s9 + $0xc8] sm:$0xff]  }
 0x23d   :  { %v2749_v26 = vld [vmem:[%s3238_s9 + $0x88] sm:$0xff]  }
 0x23e   :  { %1628 = vmatpush1.bf16.msra.mxu0 %v2676_v27  ;;  %v2750_v27 = vld [vmem:[%s3238_s9 + $0x50] sm:$0xff]  }
 0x23f   :  { %1710 = vmatpush1.bf16.msra.mxu1 %v2679_v28  ;;  %1629 = vmatprep.subr.bf16.mxu0 %v2684_v29  ;;  %v2751_v28 = vld [vmem:[%s3238_s9 + $0xd0] sm:$0xff]  }
 0x240   :  { %1711 = vmatprep.subr.bf16.mxu1 %v2687_v30  ;;  %v2752_v29 = vld [vmem:[%s3238_s9 + $0x10] sm:$0xff]  }
 0x241   :  { %v2753_v30 = vld [vmem:[%s3238_s9 + $0x90] sm:$0xff]  }
 0x242   :  { %1630 = vmatpush1.bf16.msra.mxu0 %v2682_v31  ;;  %v2754_v31 = vld [vmem:[%s3238_s9 + $0x58] sm:$0xff]  }
 0x243   :  { %1712 = vmatpush1.bf16.msra.mxu1 %v2685_v32  ;;  %1631 = vmatprep.subr.bf16.mxu0 %v2690_v33  ;;  %v2755_v32 = vld [vmem:[%s3238_s9 + $0xd8] sm:$0xff]  }
 0x244   :  { %1713 = vmatprep.subr.bf16.mxu1 %v2693_v36 }
 0x246   :  { %1632 = vmatpush1.bf16.msra.mxu0 %v2688_v35  ;;  %v2756_v35 = vld [vmem:[%s3238_s9 + $0x18] sm:$0xff]  }
 0x247   :  { %1714 = vmatpush1.bf16.msra.mxu1 %v2691_v37  ;;  %1633 = vmatprep.subr.bf16.mxu0 %v2696_v38  ;;  %v2757_v37 = vld [vmem:[%s3238_s9 + $0x98] sm:$0xff]  }
 0x248   :  { %1715 = vmatprep.subr.bf16.mxu1 %v2699_v39 }
 0x24a   :  { %1634 = vmatpush1.bf16.msra.mxu0 %v2694_v40 }
 0x24b   :  { %1716 = vmatpush1.bf16.msra.mxu1 %v2697_v42  ;;  %1635 = vmatprep.subr.bf16.mxu0 %v2702_v43 }
 0x24c   :  { %1717 = vmatprep.subr.bf16.mxu1 %v2705_v45 }
 0x24d   :  { %v3091_v50 = vpop.f32.mrb[16].mxu0  ;;  %v3093_v53 = vpop.f32.mrb[12].mxu1 }
 0x24e   :  { %v3095_v54 = vpop.f32.mrb[17].mxu0  ;;  %v3097_v55 = vpop.f32.mrb[13].mxu1  ;;  %1636 = vmatpush1.bf16.msra.mxu0 %v2700_v46  ;;  %v2758_v46 = vld [vmem:[%s3238_s9 + $0x60] sm:$0xff]  }
 0x24f   :  { %1718 = vmatpush1.bf16.msra.mxu1 %v2703_v47  ;;  %v670_v58 = vpop.f32.mrb[18].mxu0  ;;  %v711_v60 = vpop.f32.mrb[14].mxu1  ;;  %1637 = vmatprep.subr.bf16.mxu0 %v2708_v48  ;;  %v2759_v47 = vld [vmem:[%s3238_s9 + $0xe0] sm:$0xff]  }
 0x250   :  { %v671_v63 = vpop.f32.mrb[19].mxu0  ;;  %v712_v1 = vpop.f32.mrb[15].mxu1  ;;  %1719 = vmatprep.subr.bf16.mxu1 %v2711_v49  ;;  %v2760_v48 = vld [vmem:[%s3238_s9 + $0x20] sm:$0xff]   ;;  %v2763_v58 = vld [vmem:[%s3238_s9 + $0xe8] sm:$0xff]  }
 0x251   :  { %v2761_v49 = vld [vmem:[%s3238_s9 + $0xa0] sm:$0xff]   ;;  %v2764_v60 = vld [vmem:[%s3238_s9 + $0x28] sm:$0xff]   ;;  %v2767_v63 = vld [vmem:[%s3238_s9 + $0xf0] sm:$0xff]  }
 0x252   :  { %1638 = vmatpush1.bf16.msra.mxu0 %v2706_v57  ;;  %v2762_v57 = vld [vmem:[%s3238_s9 + $0x68] sm:$0xff]   ;;  %v2768_v1 = vld [vmem:[%s3238_s9 + $0x30] sm:$0xff]  }
 0x253   :  { %1720 = vmatpush1.bf16.msra.mxu1 %v2709_v61  ;;  %1639 = vmatprep.subr.bf16.mxu0 %v2714_v62  ;;  %v2765_v61 = vld [vmem:[%s3238_s9 + $0xa8] sm:$0xff]   ;;  %v2766_v62 = vld [vmem:[%s3238_s9 + $0x70] sm:$0xff]  }
 0x254   :  { %1721 = vmatprep.subr.bf16.mxu1 %v2717_v2  ;;  %v2769_v2 = vld [vmem:[%s3238_s9 + $0xb0] sm:$0xff]  }
 0x256   :  { %1640 = vmatpush1.bf16.msra.mxu0 %v2712_v56  ;;  %v2770_v56 = vld [vmem:[%s3238_s9 + $0x78] sm:$0xff]  }
 0x257   :  { %1722 = vmatpush1.bf16.msra.mxu1 %v2715_v59  ;;  %1641 = vmatprep.subr.bf16.mxu0 %v2720_v3  ;;  %v2771_v59 = vld [vmem:[%s3238_s9 + $0xf8] sm:$0xff]  }
 0x258   :  { %1723 = vmatprep.subr.bf16.mxu1 %v2723_v4  ;;  %v2772_v3 = vld [vmem:[%s3238_s9 + $0x38] sm:$0xff]  }
 0x259   :  { %v2773_v4 = vld [vmem:[%s3238_s9 + $0xb8] sm:$0xff]  }
 0x25a   :  { %1642 = vmatpush1.bf16.msra.mxu0 %v2718_v5  ;;  %v65_v5 = vld [vmem:[%s3239_s10 + $0x8] sm:$0xf] }
 0x25b   :  { %1724 = vmatpush1.bf16.msra.mxu1 %v2721_v6  ;;  %1643 = vmatprep.subr.bf16.mxu0 %v2726_v7  ;;  %v1745_v6 = vstv %s3240_s11 }
 0x25c   :  { %1725 = vmatprep.subr.bf16.mxu1 %v2729_v8  ;;  %v1746_v7 = vmul.f32 %v1745_v6, %v65_v5  ;;  %v64_v8 = vld [vmem:[%s3239_s10 + $0x4] sm:$0xf] }
 0x25e   :  { %1644 = vmatpush1.bf16.msra.mxu0 %v2724_v9  ;;  %v1751_v9 = vrot.slane %v1746_v7, %v2994_v34 }
 0x25f   :  { %1726 = vmatpush1.bf16.msra.mxu1 %v2727_v10  ;;  %1645 = vmatprep.subr.bf16.mxu0 %v2732_v11  ;;  %v1759_v11 = vrot.slane %v1746_v7, %v3056_v13 }
 0x260   :  { %1727 = vmatprep.subr.bf16.mxu1 %v2735_v12  ;;  %v1755_v12 = vrot.slane %v1746_v7, %v3068_v18 }
 0x262   :  { %1646 = vmatpush1.bf16.msra.mxu0 %v2730_v15 }
 0x263   :  { %1728 = vmatpush1.bf16.msra.mxu1 %v2733_v52  ;;  %1647 = vmatprep.subr.bf16.mxu0 %v2738_v16  ;;  %v1776_v52 = vrot.slane %v64_v8, %v2994_v34 }
 0x264   :  { %1729 = vmatprep.subr.bf16.mxu1 %v2741_v17 }
 0x266   :  { %1648 = vmatpush1.bf16.msra.mxu0 %v2736_v44  ;;  %v1763_v44 = vrot.slane %v1746_v7, %v3059_v14 }
 0x267   :  { %1730 = vmatpush1.bf16.msra.mxu1 %v2739_v0  ;;  %2421 = vmatprep.subr.bf16.mxu0 %v2742_v19  ;;  %v1784_v19 = vrot.slane %v64_v8, %v3056_v13 }
 0x268   :  { %2443 = vmatprep.subr.bf16.mxu1 %v2743_v20 }
 0x269   :  { %1650 = vmatmul.mubr.bf16.vlgmr.msra.gmra.mrb[24].mxu0 %v806_v22 }
 0x26a   :  { %1732 = vmatmul.mubr.bf16.vlgmr.msra.gmra.mrb[20].mxu1 %v806_v22  ;;  %2422 = vmatpush3.bf16.msra.mxu0 %v2744_v21  ;;  %v1780_v21 = vrot.slane %v64_v8, %v3068_v18 }
 0x26b   :  { %2444 = vmatpush3.bf16.msra.mxu1 %v2745_v23  ;;  %2423 = vmatprep.subr.bf16.mxu0 %v2746_v24 }
 0x26c   :  { %2445 = vmatprep.subr.bf16.mxu1 %v2747_v25 }
 0x26e   :  { %2424 = vmatpush3.bf16.msra.mxu0 %v2748_v41  ;;  %v1788_v41 = vrot.slane %v64_v8, %v3059_v14 }
 0x26f   :  { %2446 = vmatpush3.bf16.msra.mxu1 %v2749_v26  ;;  %2425 = vmatprep.subr.bf16.mxu0 %v2750_v27 }
 0x270   :  { %2447 = vmatprep.subr.bf16.mxu1 %v2751_v28 }
 0x272   :  { %2426 = vmatpush3.bf16.msra.mxu0 %v2752_v29 }
 0x273   :  { %2448 = vmatpush3.bf16.msra.mxu1 %v2753_v30  ;;  %2427 = vmatprep.subr.bf16.mxu0 %v2754_v31 }
 0x274   :  { %2449 = vmatprep.subr.bf16.mxu1 %v2755_v32 }
 0x276   :  { %2428 = vmatpush3.bf16.msra.mxu0 %v2756_v35 }
 0x277   :  { %2450 = vmatpush3.bf16.msra.mxu1 %v2757_v37  ;;  %2429 = vmatprep.subr.bf16.mxu0 %v2758_v46 }
 0x278   :  { %2451 = vmatprep.subr.bf16.mxu1 %v2759_v47 }
 0x27a   :  { %2430 = vmatpush3.bf16.msra.mxu0 %v2760_v48 }
 0x27b   :  { %2452 = vmatpush3.bf16.msra.mxu1 %v2761_v49  ;;  %2431 = vmatprep.subr.bf16.mxu0 %v2762_v57 }
 0x27c   :  { %2453 = vmatprep.subr.bf16.mxu1 %v2763_v58 }
 0x27e   :  { %2432 = vmatpush3.bf16.msra.mxu0 %v2764_v60 }
 0x27f   :  { %2454 = vmatpush3.bf16.msra.mxu1 %v2765_v61  ;;  %2433 = vmatprep.subr.bf16.mxu0 %v2766_v62 }
 0x280   :  { %2455 = vmatprep.subr.bf16.mxu1 %v2767_v63 }
 0x282   :  { %2434 = vmatpush3.bf16.msra.mxu0 %v2768_v1 }
 0x283   :  { %2456 = vmatpush3.bf16.msra.mxu1 %v2769_v2  ;;  %2435 = vmatprep.subr.bf16.mxu0 %v2770_v56 }
 0x284   :  { %2457 = vmatprep.subr.bf16.mxu1 %v2771_v59 }
 0x286   :  { %2436 = vmatpush3.bf16.msra.mxu0 %v2772_v3 }
 0x287   :  { %2458 = vmatpush3.bf16.msra.mxu1 %v2773_v4 }
 0x2bc   :  { %v752_v33 = vpop.f32.mrb[20].mxu0  ;;  %v793_v36 = vpop.f32.mrb[16].mxu1 }
 0x2bd   :  { %v754_v38 = vpop.f32.mrb[21].mxu0  ;;  %v795_v39 = vpop.f32.mrb[17].mxu1 }
 0x2be   :  { %v756_v40 = vpop.f32.mrb[22].mxu0  ;;  %v797_v42 = vpop.f32.mrb[18].mxu1 }
 0x2bf   :  { %v757_v43 = vpop.f32.mrb[23].mxu0  ;;  %v798_v45 = vpop.f32.mrb[19].mxu1 }
 0x33c   :  { %v1651_v10 = vpop.f32.mrb[24].mxu0 }
 0x33d   :  { %v1740_v15 = vmul.f32 %v1651_v10, %v752_v33  ;;  %v1733_v16 = vpop.f32.mrb[20].mxu1  ;;  %v1653_v17 = vpop.f32.mrb[25].mxu0 }
 0x33e   :  { %v1742_v0 = vmul.f32 %v1733_v16, %v793_v36  ;;  %v1741_v20 = vmul.f32 %v1653_v17, %v754_v38  ;;  %v1735_v22 = vpop.f32.mrb[21].mxu1  ;;  %v1655_v23 = vpop.f32.mrb[26].mxu0 }
 0x33f   :  { %v1768_v24 = vadd.f32 %v1751_v9, %v1740_v15  ;;  %v1743_v25 = vmul.f32 %v1735_v22, %v795_v39  ;;  %v1737_v26 = vpop.f32.mrb[22].mxu1  ;;  %v1656_v27 = vpop.f32.mrb[27].mxu0 }
 0x340   :  { %v1770_v28 = vadd.f32 %v1759_v11, %v1742_v0  ;;  %v1769_v34 = vadd.f32 %v1755_v12, %v1741_v20  ;;  %v1738_v29 = vpop.f32.mrb[23].mxu1 }
 0x341   :  { %v1793_v30 = vadd.f32 %v1776_v52, %v1768_v24  ;;  %v1771_v31 = vadd.f32 %v1763_v44, %v1743_v25 }
 0x342   :  { %v1795_v32 = vadd.f32 %v1784_v19, %v1770_v28  ;;  %v1794_v33 = vadd.f32 %v1780_v21, %v1769_v34 }
 0x343   :  { %vm1797_vm7 = vcmp.ge.f32.partialorder %v1793_v30, 0.0  ;;  %v1801_v13 = vmul.f32 0.2, %v1793_v30  ;;  %v1796_v36 = vadd.f32 %v1788_v41, %v1771_v31 }
 0x344   :  { %vm1799_vm8 = vcmp.ge.f32.partialorder %v1795_v32, 0.0  ;;  %v1803_v18 = vmul.f32 0.2, %v1795_v32  ;;  %vm1798_vm9 = vcmp.ge.f32.partialorder %v1794_v33, 0.0  ;;  %v1802_v35 = vmul.f32 0.2, %v1794_v33 }
 0x345   :  { %v1805_v37 = vsel %vm1797_vm7, %v1793_v30, %v1801_v13  ;;  %vm1800_vm10 = vcmp.ge.f32.partialorder %v1796_v36, 0.0  ;;  %v1804_v38 = vmul.f32 0.2, %v1796_v36 }
 0x346   :  { %v1809_v14 = vmul.f32 1.4142135, %v1805_v37  ;;  %v1807_v39 = vsel %vm1799_vm8, %v1795_v32, %v1803_v18  ;;  %v1806_v40 = vsel %vm1798_vm9, %v1794_v33, %v1802_v35 }
 0x347   :  { %v1811_v42 = vmul.f32 1.4142135, %v1807_v39  ;;  %v1810_v43 = vmul.f32 1.4142135, %v1806_v40  ;;  %v1808_v45 = vsel %vm1800_vm10, %v1796_v36, %v1804_v38 }
 0x348   :  { %v2371_v46 = vclamps-f32 %v1809_v14, 256.0  ;;  %v1812_v47 = vmul.f32 1.4142135, %v1808_v45 }
 0x349   :  { %v2373_v48 = vclamps-f32 %v1811_v42, 256.0  ;;  %v2372_v49 = vclamps-f32 %v1810_v43, 256.0 }
 0x34a   :  { %v2374_v57 = vclamps-f32 %v1812_v47, 256.0  ;;  %v1844_v58 = vmul.f32 %v2371_v46, %v3091_v50 }
 0x34b   :  { %v1825_v60 = vcombine.low %v2371_v46, %v2372_v49  ;;  %v1845_v61 = vmul.f32 %v2372_v49, %v3095_v54  ;;  %v1846_v62 = vmul.f32 %v2373_v48, %v3093_v53  ;;  %v2375_v54 = vld [vmem:[%s3239_s10 + $0xd] ss:$0 sm:$0xff] }
 0x34c   :  { %v1826_v63 = vcombine.low %v2373_v48, %v2374_v57  ;;  %v1847_v1 = vmul.f32 %v2374_v57, %v3097_v55  ;;  %v1848_v4 = vpack.c.bf16 %v1844_v58, %v1844_v58 }
 0x34d   :  { %v1833_v2 = vrot.slane %v1825_v60, %v3010_v51  ;;  %v1849_v56 = vpack.c.bf16 %v1845_v61, %v1845_v61  ;;  %v1850_v5 = vpack.c.bf16 %v1846_v62, %v1846_v62 }
 0x34e   :  { %v1840_v59 = vrot.slane %v1826_v63, %v3010_v51  ;;  %v1851_v3 = vpack.c.bf16 %v1847_v1, %v1847_v1 }
 0x34f   :  { %2146 = vmatprep.mubr.bf16.mxu0 %v1849_v56 }
 0x350   :  { %v1841_v6 = vcombine.low %v1833_v2, %v1840_v59  ;;  %2186 = vmatprep.mubr.bf16.mxu1 %v1851_v3  ;;  %2147 = vmatmul.mubr.bf16.vlgmr.msra.gmra.mrb[28].mxu0 %v1848_v4 }
 0x351   :  { %2187 = vmatmul.mubr.bf16.vlgmr.msra.gmra.mrb[24].mxu1 %v1850_v5 }
 0x352   :  { %1843 = vst [vmem:[%s3241_s12] sm:$0xff] %v1841_v6 }
 0x423   :  { %v2437_v50 = vpop.f32.mrb[28].mxu0 }
 0x424   :  { %v2459_v53 = vpop.f32.mrb[24].mxu1  ;;  %v2438_v55 = vpop.f32.mrb[29].mxu0 }
 0x425   :  { %v2439_v51 = vadd.f32 %v2438_v55, %v2437_v50  ;;  %v2460_v7 = vpop.f32.mrb[25].mxu1  ;;  %v2440_v8 = vpop.f32.mrb[30].mxu0 }
 0x426   :  { %v2461_v9 = vadd.f32 %v2460_v7, %v2459_v53  ;;  %v2462_v10 = vpop.f32.mrb[26].mxu1  ;;  %v2441_v11 = vpop.f32.mrb[31].mxu0 }
 0x427   :  { %v2149_v12 = vadd.f32 %v2439_v51, %v2375_v54  ;;  %v2463_v15 = vpop.f32.mrb[27].mxu1 }
 0x429   :  { %v2189_v52 = vadd.f32 %v2461_v9, %v2149_v12 }
 0x42b   :  { %2195 = vst.msk [vmem:[%s3242_s13] sm:$0x3] %vm2194_vm11, %v2189_v52 }
 0x42c   :  { %2204 = vsyncpa [#allocation4], 1 }

</bundles_post_ra>
